<compile_context>
chip_gen: v6e
topology: v6e:2x2x1
jax: 0.10.0
libtpu: 0.0.40
codegen_flags: <defaults>
</compile_context>

<pallas_src>
import functools

import jax
import jax.numpy as jnp
from jax.experimental import pallas as pl
from jax.experimental.pallas import tpu as pltpu


# ----------------------------------------------------------------------------
# Pallas kernels
# ----------------------------------------------------------------------------
def _conv_kernel(x_ref, w_ref, b_ref, o_ref, acc_ref, *, kh, kw, wp, m, act):
    """Stride-1 'valid' conv over a flattened padded image.

    x_ref:   (Lp, Cin)       bf16   flattened padded activation (+ tail pad)
    w_ref:   (kh*kw, Cin, N) bf16   per-tap weight matrices (N lane-padded)
    b_ref:   (1, N)          f32    bias (zero-padded)
    o_ref:   (M, N)                 M = Ho * Wp  (over-wide rows, sliced later)
    acc_ref: (M, N)          f32    VMEM accumulator scratch
    """
    for i in range(kh):
        for j in range(kw):
            t = i * kw + j
            off = i * wp + j                       # static offset -> contiguous slab
            a = x_ref[off:off + m, :]              # (M, Cin) bf16
            c = jnp.dot(a, w_ref[t], preferred_element_type=jnp.float32)
            if t == 0:
                acc_ref[...] = c
            else:
                acc_ref[...] += c
    y = acc_ref[...] + b_ref[...]
    if act == "sigmoid":
        # exp lands on the EUP slot; exact divide keeps the [0, 1] range tight.
        y = 1.0 / (1.0 + jnp.exp(-y))
    o_ref[...] = y.astype(o_ref.dtype)


def _in_kernel(x_ref, o_ref, *, relu, eps):
    """InstanceNorm2d(affine=False) on an NHWC (H*W, C) block, f32 internally."""
    x = x_ref[...].astype(jnp.float32)
    mean = jnp.mean(x, axis=0, keepdims=True)
    xc = x - mean
    var = jnp.mean(xc * xc, axis=0, keepdims=True)   # biased, as in PyTorch IN
    y = xc * jax.lax.rsqrt(var + eps)
    if relu:
        y = jnp.maximum(y, 0.0)
    o_ref[...] = y.astype(o_ref.dtype)


def _in_res_kernel(x_ref, r_ref, o_ref, *, eps):
    """InstanceNorm + residual add (ResNet block tail)."""
    x = x_ref[...].astype(jnp.float32)
    mean = jnp.mean(x, axis=0, keepdims=True)
    xc = x - mean
    var = jnp.mean(xc * xc, axis=0, keepdims=True)
    y = xc * jax.lax.rsqrt(var + eps) + r_ref[...].astype(jnp.float32)
    o_ref[...] = y.astype(o_ref.dtype)


# ----------------------------------------------------------------------------
# Convolution wrappers (pure-JAX glue + the Pallas kernel)
# ----------------------------------------------------------------------------
def _round_up(v, m):
    return -(-v // m) * m


def _conv_stride1(xp, w, b, *, act, out_dtype):
    """Stride-1 valid conv.  xp: (B, Hp, Wp, Cin) already padded (NHWC).
    w: (Cout, Cin, kh, kw) PyTorch layout.  Returns (B, Ho, Wp, Npad)."""
    B, Hp, Wp, Cin = xp.shape
    Cout, cin_w, kh, kw = w.shape
    assert cin_w == Cin
    Ho = Hp - kh + 1
    M = Ho * Wp                                   # over-wide output rows
    Np = _round_up(max(Cout, 1), 128)             # lane-dense output channels
    Cp = max(8, _round_up(Cin, 8))                # avoid degenerate lane dims
    Lp = Hp * Wp + (kw - 1)                       # flat length + tail pad

    xf = xp.astype(jnp.bfloat16).reshape(B, Hp * Wp, Cin)
    xf = jnp.pad(xf, ((0, 0), (0, kw - 1), (0, Cp - Cin)))
    wt = jnp.transpose(w, (2, 3, 1, 0)).reshape(kh * kw, Cin, Cout)
    wt = jnp.pad(wt.astype(jnp.bfloat16), ((0, 0), (0, Cp - Cin), (0, Np - Cout)))
    if b is None:
        b = jnp.zeros((Cout,), jnp.float32)
    bias = jnp.pad(b.astype(jnp.float32), (0, Np - Cout)).reshape(1, Np)

    kernel = functools.partial(_conv_kernel, kh=kh, kw=kw, wp=Wp, m=M, act=act)
    out = pl.pallas_call(
        kernel,
        out_shape=jax.ShapeDtypeStruct((B, M, Np), out_dtype),
        grid=(B,),
        in_specs=[
            pl.BlockSpec((None, Lp, Cp), lambda i: (i, 0, 0)),
            pl.BlockSpec((kh * kw, Cp, Np), lambda i: (0, 0, 0)),
            pl.BlockSpec((1, Np), lambda i: (0, 0)),
        ],
        out_specs=pl.BlockSpec((None, M, Np), lambda i: (i, 0, 0)),
        scratch_shapes=[pltpu.VMEM((M, Np), jnp.float32)],
        compiler_params=pltpu.CompilerParams(dimension_semantics=("parallel",)),
    )(xf, wt, bias)
    # TODO(synk): add M-tiling for very large spatial extents (full-image blocks
    # assume the per-batch accumulator fits VMEM, true at these sizes).
    return out.reshape(B, Ho, Wp, Np)


def conv2d(x, w, b=None, *, stride=1, padding=0, act=None,
           out_dtype=jnp.bfloat16):
    """x: (B, H, W, Cin) NHWC, w: (Cout, Cin, kh, kw) -> (B, Ho, Wo, Cout)."""
    if padding:
        x = jnp.pad(x, ((0, 0), (padding, padding), (padding, padding), (0, 0)))
    B, Hp, Wp, Cin = x.shape
    Cout, _, kh, kw = w.shape
    Wo_full = Wp - kw + 1
    out = _conv_stride1(x, w, b, act=act, out_dtype=out_dtype)
    # drop the over-wide columns / padded channels, apply stride by subsampling
    return out[:, ::stride, 0:Wo_full:stride, :Cout]


def conv_transpose2d(x, w, b, *, stride, padding, output_padding):
    """x: (B, H, W, Cin) NHWC, w: (Cin, Cout, kh, kw) [PyTorch layout]."""
    B, H, W, Cin = x.shape
    _, Cout, kh, kw = w.shape
    Hd, Wd = (H - 1) * stride + 1, (W - 1) * stride + 1
    xd = jnp.zeros((B, Hd, Wd, Cin), x.dtype).at[:, ::stride, ::stride, :].set(x)
    p0 = kh - 1 - padding
    p1 = kh - 1 - padding + output_padding
    q0 = kw - 1 - padding
    q1 = kw - 1 - padding + output_padding
    xd = jnp.pad(xd, ((0, 0), (p0, p1), (q0, q1), (0, 0)))
    wd = jnp.flip(w, axis=(-2, -1)).transpose(1, 0, 2, 3)   # (Cout, Cin, kh, kw)
    return conv2d(xd, wd, b, stride=1, padding=0)


def instance_norm(x, residual=None, *, relu=False, eps=1e-5,
                  out_dtype=jnp.bfloat16):
    """x: (B, H, W, C) NHWC; InstanceNorm2d(affine=False) + ReLU / +residual."""
    B, H, W, C = x.shape
    S = H * W
    spec = pl.BlockSpec((None, S, C), lambda i: (i, 0, 0))
    cp = pltpu.CompilerParams(dimension_semantics=("parallel",))
    if residual is None:
        out = pl.pallas_call(
            functools.partial(_in_kernel, relu=relu, eps=eps),
            out_shape=jax.ShapeDtypeStruct((B, S, C), out_dtype),
            grid=(B,), in_specs=[spec], out_specs=spec, compiler_params=cp,
        )(x.reshape(B, S, C))
    else:
        out = pl.pallas_call(
            functools.partial(_in_res_kernel, eps=eps),
            out_shape=jax.ShapeDtypeStruct((B, S, C), out_dtype),
            grid=(B,), in_specs=[spec, spec], out_specs=spec, compiler_params=cp,
        )(x.reshape(B, S, C), residual.reshape(B, S, C))
    return out.reshape(B, H, W, C)


def reflect_pad(x, p):
    return jnp.pad(x, ((0, 0), (p, p), (p, p), (0, 0)), mode="reflect")


# ----------------------------------------------------------------------------
# Generator forward (NHWC internally, NCHW at the API boundary)
# ----------------------------------------------------------------------------
def encoder_node(x, w, b, *, stride, padding):
    y = conv2d(x, w, b, stride=stride, padding=padding)
    return instance_norm(y, relu=True)


def decoder_node(x, w, b, *, stride, padding, output_padding):
    y = conv_transpose2d(x, w, b, stride=stride, padding=padding,
                         output_padding=output_padding)
    return instance_norm(y, relu=True)


def resnet_block(x, w1, b1, w2, b2):
    # TODO(synk): ResNetBlock internals not given; canonical CycleGAN block assumed.
    y = reflect_pad(x, 1)
    y = conv2d(y, w1, b1)
    y = instance_norm(y, relu=True)
    y = reflect_pad(y, 1)
    y = conv2d(y, w2, b2)
    return instance_norm(y, residual=x)


def generator_forward(params, x_nchw):
    x = jnp.transpose(x_nchw, (0, 2, 3, 1))                 # -> NHWC
    x = reflect_pad(x, 3)                                    # padding(x)
    x = encoder_node(x, params["enc1_w"], params["enc1_b"], stride=1, padding=0)
    x = encoder_node(x, params["enc2_w"], params["enc2_b"], stride=2, padding=1)
    x = encoder_node(x, params["enc3_w"], params["enc3_b"], stride=2, padding=1)
    for i in range(10):
        x = resnet_block(x, params[f"res{i}_w1"], params[f"res{i}_b1"],
                         params[f"res{i}_w2"], params[f"res{i}_b2"])
    x = decoder_node(x, params["dec1_w"], params["dec1_b"],
                     stride=2, padding=1, output_padding=1)
    x = decoder_node(x, params["dec2_w"], params["dec2_b"],
                     stride=2, padding=1, output_padding=1)
    x = reflect_pad(x, 3)                                    # padding(x)
    x = conv2d(x, params["out_w"], None, act="sigmoid", out_dtype=jnp.float32)
    return jnp.transpose(x, (0, 3, 1, 2))                    # -> NCHW


def init_params(key, out_dim):
    """Deterministic N(0, 0.02) weights / zero biases (kernel_initializer analogue)."""
    params = {}

    def nrm(key, shape):
        return (0.02 * jax.random.normal(key, shape)).astype(jnp.float32)

    keys = iter(jax.random.split(key, 64))
    od = out_dim
    params["enc1_w"] = nrm(next(keys), (od, 1, 7, 7))
    params["enc1_b"] = jnp.zeros((od,), jnp.float32)
    params["enc2_w"] = nrm(next(keys), (2 * od, od, 3, 3))
    params["enc2_b"] = jnp.zeros((2 * od,), jnp.float32)
    params["enc3_w"] = nrm(next(keys), (4 * od, 2 * od, 3, 3))
    params["enc3_b"] = jnp.zeros((4 * od,), jnp.float32)
    for i in range(10):
        params[f"res{i}_w1"] = nrm(next(keys), (4 * od, 4 * od, 3, 3))
        params[f"res{i}_b1"] = jnp.zeros((4 * od,), jnp.float32)
        params[f"res{i}_w2"] = nrm(next(keys), (4 * od, 4 * od, 3, 3))
        params[f"res{i}_b2"] = jnp.zeros((4 * od,), jnp.float32)
    # PyTorch ConvTranspose2d weight layout: (in, out, kh, kw)
    params["dec1_w"] = nrm(next(keys), (4 * od, 2 * od, 3, 3))
    params["dec1_b"] = jnp.zeros((2 * od,), jnp.float32)
    params["dec2_w"] = nrm(next(keys), (2 * od, od, 3, 3))
    params["dec2_b"] = jnp.zeros((od,), jnp.float32)
    params["out_w"] = nrm(next(keys), (1, od, 7, 7))             # bias=False
    return params


def _check_conv():
    """Sanity-check the Pallas conv against lax.conv (bf16-rounded inputs)."""
    k1, k2 = jax.random.split(jax.random.PRNGKey(42))
    xc = jax.random.normal(k1, (2, 10, 10, 8), jnp.float32)
    wc = 0.1 * jax.random.normal(k2, (16, 8, 3, 3), jnp.float32)
    bc = jnp.zeros((16,), jnp.float32)
    got = conv2d(xc, wc, bc, stride=2, padding=1, out_dtype=jnp.float32)
    xr = xc.astype(jnp.bfloat16).astype(jnp.float32)
    wr = wc.astype(jnp.bfloat16).astype(jnp.float32)
    ref = jax.lax.conv_general_dilated(
        xr, jnp.transpose(wr, (2, 3, 1, 0)),                # HWIO
        window_strides=(2, 2), padding=((1, 1), (1, 1)),
        dimension_numbers=("NHWC", "HWIO", "NHWC"),
        precision=jax.lax.Precision.HIGHEST)
    err = float(jnp.max(jnp.abs(got - ref)))
    assert err < 2e-2, f"conv mismatch, max abs err = {err}"


if __name__ == "__main__":
    OUT_DIM = 8          # small synthetic width (module default is 64)
    B, H, W = 2, 32, 32  # input is single-channel NCHW, as the first conv implies

    key = jax.random.PRNGKey(0)
    k_params, k_x = jax.random.split(key)
    params = init_params(k_params, OUT_DIM)
    x = jax.random.normal(k_x, (B, 1, H, W), dtype=jnp.float32)

    _check_conv()        # validate the flat-window Pallas conv kernel

    fwd = jax.jit(generator_forward)
    y = jax.block_until_ready(fwd(params, x))

    assert y.shape == (B, 1, H, W), y.shape
    assert bool(jnp.all((y >= 0.0) & (y <= 1.0))), "sigmoid range violated"
    print("KERNEL_OK")
</pallas_src>

<mosaic_0001>
module attributes {stable_mosaic.version = 11 : i64} {
  func.func @_conv_kernel(%arg0: i32, %arg1: memref<1x146x8xbf16, #tpu.memory_space<vmem>>, %arg2: memref<9x8x128xbf16, #tpu.memory_space<vmem>>, %arg3: memref<1x128xf32, #tpu.memory_space<vmem>>, %arg4: memref<1x120x128xf32, #tpu.memory_space<vmem>>, %arg5: memref<120x128xf32, #tpu.memory_space<vmem>>) attributes {dimension_semantics = [#tpu.dimension_semantics<parallel>], iteration_bounds = array<i64: 2>, scalar_prefetch = 0 : i64, scratch_operands = 1 : i64, tpu.core_type = #tpu.core_type<tc>, window_params = [{transform_indices = @transform_0, window_bounds = array<i64: 1, 146, 8>}, {pipeline_mode = #tpu.pipeline_mode<synchronous>, transform_indices = @transform_1, window_bounds = array<i64: 9, 8, 128>}, {pipeline_mode = #tpu.pipeline_mode<synchronous>, transform_indices = @transform_2, window_bounds = array<i64: 1, 128>}, {transform_indices = @transform_3, window_bounds = array<i64: 1, 120, 128>}]} {
    %c0 = arith.constant 0 : index
    %c0_0 = arith.constant 0 : index
    %c0_1 = arith.constant 0 : index
    %0 = vector.load %arg1[%c0, %c0_0, %c0_1] : memref<1x146x8xbf16, #tpu.memory_space<vmem>>, vector<1x120x8xbf16>
    %1 = vector.shape_cast %0 : vector<1x120x8xbf16> to vector<120x8xbf16>
    %c0_2 = arith.constant 0 : index
    %c0_3 = arith.constant 0 : index
    %c0_4 = arith.constant 0 : index
    %2 = vector.load %arg2[%c0_2, %c0_3, %c0_4] : memref<9x8x128xbf16, #tpu.memory_space<vmem>>, vector<1x8x128xbf16>
    %3 = vector.shape_cast %2 : vector<1x8x128xbf16> to vector<8x128xbf16>
    %cst = arith.constant dense<0.000000e+00> : vector<120x128xf32>
    %4 = tpu.matmul %1, %3, %cst {dimension_numbers = #tpu.dot_dimension_numbers<[1], [0], [0], [1], [0, 0, 1, 1], [], []>} : vector<120x8xbf16>, vector<8x128xbf16>, vector<120x128xf32> -> vector<120x128xf32>
    %c0_5 = arith.constant 0 : index
    %c0_6 = arith.constant 0 : index
    %5 = vector.load %arg5[%c0_5, %c0_6] : memref<120x128xf32, #tpu.memory_space<vmem>>, vector<120x128xf32>
    tpu.vector_store %arg5[%c0_5, %c0_6], %4 {strides = array<i32>} : memref<120x128xf32, #tpu.memory_space<vmem>>, vector<120x128xf32>,
    %c0_7 = arith.constant 0 : index
    %c1 = arith.constant 1 : index
    %c0_8 = arith.constant 0 : index
    %6 = vector.load %arg1[%c0_7, %c1, %c0_8] : memref<1x146x8xbf16, #tpu.memory_space<vmem>>, vector<1x120x8xbf16>
    %7 = vector.shape_cast %6 : vector<1x120x8xbf16> to vector<120x8xbf16>
    %c1_9 = arith.constant 1 : index
    %c0_10 = arith.constant 0 : index
    %c0_11 = arith.constant 0 : index
    %8 = vector.load %arg2[%c1_9, %c0_10, %c0_11] : memref<9x8x128xbf16, #tpu.memory_space<vmem>>, vector<1x8x128xbf16>
    %9 = vector.shape_cast %8 : vector<1x8x128xbf16> to vector<8x128xbf16>
    %cst_12 = arith.constant dense<0.000000e+00> : vector<120x128xf32>
    %10 = tpu.matmul %7, %9, %cst_12 {dimension_numbers = #tpu.dot_dimension_numbers<[1], [0], [0], [1], [0, 0, 1, 1], [], []>} : vector<120x8xbf16>, vector<8x128xbf16>, vector<120x128xf32> -> vector<120x128xf32>
    %c0_13 = arith.constant 0 : index
    %c0_14 = arith.constant 0 : index
    %11 = vector.load %arg5[%c0_13, %c0_14] : memref<120x128xf32, #tpu.memory_space<vmem>>, vector<120x128xf32>
    %12 = arith.addf %11, %10 : vector<120x128xf32>
    %c0_15 = arith.constant 0 : index
    %c0_16 = arith.constant 0 : index
    %13 = vector.load %arg5[%c0_15, %c0_16] : memref<120x128xf32, #tpu.memory_space<vmem>>, vector<120x128xf32>
    tpu.vector_store %arg5[%c0_15, %c0_16], %12 {strides = array<i32>} : memref<120x128xf32, #tpu.memory_space<vmem>>, vector<120x128xf32>,
    %c0_17 = arith.constant 0 : index
    %c2 = arith.constant 2 : index
    %c0_18 = arith.constant 0 : index
    %14 = vector.load %arg1[%c0_17, %c2, %c0_18] : memref<1x146x8xbf16, #tpu.memory_space<vmem>>, vector<1x120x8xbf16>
    %15 = vector.shape_cast %14 : vector<1x120x8xbf16> to vector<120x8xbf16>
    %c2_19 = arith.constant 2 : index
    %c0_20 = arith.constant 0 : index
    %c0_21 = arith.constant 0 : index
    %16 = vector.load %arg2[%c2_19, %c0_20, %c0_21] : memref<9x8x128xbf16, #tpu.memory_space<vmem>>, vector<1x8x128xbf16>
    %17 = vector.shape_cast %16 : vector<1x8x128xbf16> to vector<8x128xbf16>
    %cst_22 = arith.constant dense<0.000000e+00> : vector<120x128xf32>
    %18 = tpu.matmul %15, %17, %cst_22 {dimension_numbers = #tpu.dot_dimension_numbers<[1], [0], [0], [1], [0, 0, 1, 1], [], []>} : vector<120x8xbf16>, vector<8x128xbf16>, vector<120x128xf32> -> vector<120x128xf32>
    %c0_23 = arith.constant 0 : index
    %c0_24 = arith.constant 0 : index
    %19 = vector.load %arg5[%c0_23, %c0_24] : memref<120x128xf32, #tpu.memory_space<vmem>>, vector<120x128xf32>
    %20 = arith.addf %19, %18 : vector<120x128xf32>
    %c0_25 = arith.constant 0 : index
    %c0_26 = arith.constant 0 : index
    %21 = vector.load %arg5[%c0_25, %c0_26] : memref<120x128xf32, #tpu.memory_space<vmem>>, vector<120x128xf32>
    tpu.vector_store %arg5[%c0_25, %c0_26], %20 {strides = array<i32>} : memref<120x128xf32, #tpu.memory_space<vmem>>, vector<120x128xf32>,
    %c0_27 = arith.constant 0 : index
    %c12 = arith.constant 12 : index
    %c0_28 = arith.constant 0 : index
    %22 = vector.load %arg1[%c0_27, %c12, %c0_28] : memref<1x146x8xbf16, #tpu.memory_space<vmem>>, vector<1x120x8xbf16>
    %23 = vector.shape_cast %22 : vector<1x120x8xbf16> to vector<120x8xbf16>
    %c3 = arith.constant 3 : index
    %c0_29 = arith.constant 0 : index
    %c0_30 = arith.constant 0 : index
    %24 = vector.load %arg2[%c3, %c0_29, %c0_30] : memref<9x8x128xbf16, #tpu.memory_space<vmem>>, vector<1x8x128xbf16>
    %25 = vector.shape_cast %24 : vector<1x8x128xbf16> to vector<8x128xbf16>
    %cst_31 = arith.constant dense<0.000000e+00> : vector<120x128xf32>
    %26 = tpu.matmul %23, %25, %cst_31 {dimension_numbers = #tpu.dot_dimension_numbers<[1], [0], [0], [1], [0, 0, 1, 1], [], []>} : vector<120x8xbf16>, vector<8x128xbf16>, vector<120x128xf32> -> vector<120x128xf32>
    %c0_32 = arith.constant 0 : index
    %c0_33 = arith.constant 0 : index
    %27 = vector.load %arg5[%c0_32, %c0_33] : memref<120x128xf32, #tpu.memory_space<vmem>>, vector<120x128xf32>
    %28 = arith.addf %27, %26 : vector<120x128xf32>
    %c0_34 = arith.constant 0 : index
    %c0_35 = arith.constant 0 : index
    %29 = vector.load %arg5[%c0_34, %c0_35] : memref<120x128xf32, #tpu.memory_space<vmem>>, vector<120x128xf32>
    tpu.vector_store %arg5[%c0_34, %c0_35], %28 {strides = array<i32>} : memref<120x128xf32, #tpu.memory_space<vmem>>, vector<120x128xf32>,
    %c0_36 = arith.constant 0 : index
    %c13 = arith.constant 13 : index
    %c0_37 = arith.constant 0 : index
    %30 = vector.load %arg1[%c0_36, %c13, %c0_37] : memref<1x146x8xbf16, #tpu.memory_space<vmem>>, vector<1x120x8xbf16>
    %31 = vector.shape_cast %30 : vector<1x120x8xbf16> to vector<120x8xbf16>
    %c4 = arith.constant 4 : index
    %c0_38 = arith.constant 0 : index
    %c0_39 = arith.constant 0 : index
    %32 = vector.load %arg2[%c4, %c0_38, %c0_39] : memref<9x8x128xbf16, #tpu.memory_space<vmem>>, vector<1x8x128xbf16>
    %33 = vector.shape_cast %32 : vector<1x8x128xbf16> to vector<8x128xbf16>
    %cst_40 = arith.constant dense<0.000000e+00> : vector<120x128xf32>
    %34 = tpu.matmul %31, %33, %cst_40 {dimension_numbers = #tpu.dot_dimension_numbers<[1], [0], [0], [1], [0, 0, 1, 1], [], []>} : vector<120x8xbf16>, vector<8x128xbf16>, vector<120x128xf32> -> vector<120x128xf32>
    %c0_41 = arith.constant 0 : index
    %c0_42 = arith.constant 0 : index
    %35 = vector.load %arg5[%c0_41, %c0_42] : memref<120x128xf32, #tpu.memory_space<vmem>>, vector<120x128xf32>
    %36 = arith.addf %35, %34 : vector<120x128xf32>
    %c0_43 = arith.constant 0 : index
    %c0_44 = arith.constant 0 : index
    %37 = vector.load %arg5[%c0_43, %c0_44] : memref<120x128xf32, #tpu.memory_space<vmem>>, vector<120x128xf32>
    tpu.vector_store %arg5[%c0_43, %c0_44], %36 {strides = array<i32>} : memref<120x128xf32, #tpu.memory_space<vmem>>, vector<120x128xf32>,
    %c0_45 = arith.constant 0 : index
    %c14 = arith.constant 14 : index
    %c0_46 = arith.constant 0 : index
    %38 = vector.load %arg1[%c0_45, %c14, %c0_46] : memref<1x146x8xbf16, #tpu.memory_space<vmem>>, vector<1x120x8xbf16>
    %39 = vector.shape_cast %38 : vector<1x120x8xbf16> to vector<120x8xbf16>
    %c5 = arith.constant 5 : index
    %c0_47 = arith.constant 0 : index
    %c0_48 = arith.constant 0 : index
    %40 = vector.load %arg2[%c5, %c0_47, %c0_48] : memref<9x8x128xbf16, #tpu.memory_space<vmem>>, vector<1x8x128xbf16>
    %41 = vector.shape_cast %40 : vector<1x8x128xbf16> to vector<8x128xbf16>
    %cst_49 = arith.constant dense<0.000000e+00> : vector<120x128xf32>
    %42 = tpu.matmul %39, %41, %cst_49 {dimension_numbers = #tpu.dot_dimension_numbers<[1], [0], [0], [1], [0, 0, 1, 1], [], []>} : vector<120x8xbf16>, vector<8x128xbf16>, vector<120x128xf32> -> vector<120x128xf32>
    %c0_50 = arith.constant 0 : index
    %c0_51 = arith.constant 0 : index
    %43 = vector.load %arg5[%c0_50, %c0_51] : memref<120x128xf32, #tpu.memory_space<vmem>>, vector<120x128xf32>
    %44 = arith.addf %43, %42 : vector<120x128xf32>
    %c0_52 = arith.constant 0 : index
    %c0_53 = arith.constant 0 : index
    %45 = vector.load %arg5[%c0_52, %c0_53] : memref<120x128xf32, #tpu.memory_space<vmem>>, vector<120x128xf32>
    tpu.vector_store %arg5[%c0_52, %c0_53], %44 {strides = array<i32>} : memref<120x128xf32, #tpu.memory_space<vmem>>, vector<120x128xf32>,
    %c0_54 = arith.constant 0 : index
    %c24 = arith.constant 24 : index
    %c0_55 = arith.constant 0 : index
    %46 = vector.load %arg1[%c0_54, %c24, %c0_55] : memref<1x146x8xbf16, #tpu.memory_space<vmem>>, vector<1x120x8xbf16>
    %47 = vector.shape_cast %46 : vector<1x120x8xbf16> to vector<120x8xbf16>
    %c6 = arith.constant 6 : index
    %c0_56 = arith.constant 0 : index
    %c0_57 = arith.constant 0 : index
    %48 = vector.load %arg2[%c6, %c0_56, %c0_57] : memref<9x8x128xbf16, #tpu.memory_space<vmem>>, vector<1x8x128xbf16>
    %49 = vector.shape_cast %48 : vector<1x8x128xbf16> to vector<8x128xbf16>
    %cst_58 = arith.constant dense<0.000000e+00> : vector<120x128xf32>
    %50 = tpu.matmul %47, %49, %cst_58 {dimension_numbers = #tpu.dot_dimension_numbers<[1], [0], [0], [1], [0, 0, 1, 1], [], []>} : vector<120x8xbf16>, vector<8x128xbf16>, vector<120x128xf32> -> vector<120x128xf32>
    %c0_59 = arith.constant 0 : index
    %c0_60 = arith.constant 0 : index
    %51 = vector.load %arg5[%c0_59, %c0_60] : memref<120x128xf32, #tpu.memory_space<vmem>>, vector<120x128xf32>
    %52 = arith.addf %51, %50 : vector<120x128xf32>
    %c0_61 = arith.constant 0 : index
    %c0_62 = arith.constant 0 : index
    %53 = vector.load %arg5[%c0_61, %c0_62] : memref<120x128xf32, #tpu.memory_space<vmem>>, vector<120x128xf32>
    tpu.vector_store %arg5[%c0_61, %c0_62], %52 {strides = array<i32>} : memref<120x128xf32, #tpu.memory_space<vmem>>, vector<120x128xf32>,
    %c0_63 = arith.constant 0 : index
    %c25 = arith.constant 25 : index
    %c0_64 = arith.constant 0 : index
    %54 = vector.load %arg1[%c0_63, %c25, %c0_64] : memref<1x146x8xbf16, #tpu.memory_space<vmem>>, vector<1x120x8xbf16>
    %55 = vector.shape_cast %54 : vector<1x120x8xbf16> to vector<120x8xbf16>
    %c7 = arith.constant 7 : index
    %c0_65 = arith.constant 0 : index
    %c0_66 = arith.constant 0 : index
    %56 = vector.load %arg2[%c7, %c0_65, %c0_66] : memref<9x8x128xbf16, #tpu.memory_space<vmem>>, vector<1x8x128xbf16>
    %57 = vector.shape_cast %56 : vector<1x8x128xbf16> to vector<8x128xbf16>
    %cst_67 = arith.constant dense<0.000000e+00> : vector<120x128xf32>
    %58 = tpu.matmul %55, %57, %cst_67 {dimension_numbers = #tpu.dot_dimension_numbers<[1], [0], [0], [1], [0, 0, 1, 1], [], []>} : vector<120x8xbf16>, vector<8x128xbf16>, vector<120x128xf32> -> vector<120x128xf32>
    %c0_68 = arith.constant 0 : index
    %c0_69 = arith.constant 0 : index
    %59 = vector.load %arg5[%c0_68, %c0_69] : memref<120x128xf32, #tpu.memory_space<vmem>>, vector<120x128xf32>
    %60 = arith.addf %59, %58 : vector<120x128xf32>
    %c0_70 = arith.constant 0 : index
    %c0_71 = arith.constant 0 : index
    %61 = vector.load %arg5[%c0_70, %c0_71] : memref<120x128xf32, #tpu.memory_space<vmem>>, vector<120x128xf32>
    tpu.vector_store %arg5[%c0_70, %c0_71], %60 {strides = array<i32>} : memref<120x128xf32, #tpu.memory_space<vmem>>, vector<120x128xf32>,
    %c0_72 = arith.constant 0 : index
    %c26 = arith.constant 26 : index
    %c0_73 = arith.constant 0 : index
    %62 = vector.load %arg1[%c0_72, %c26, %c0_73] : memref<1x146x8xbf16, #tpu.memory_space<vmem>>, vector<1x120x8xbf16>
    %63 = vector.shape_cast %62 : vector<1x120x8xbf16> to vector<120x8xbf16>
    %c8 = arith.constant 8 : index
    %c0_74 = arith.constant 0 : index
    %c0_75 = arith.constant 0 : index
    %64 = vector.load %arg2[%c8, %c0_74, %c0_75] : memref<9x8x128xbf16, #tpu.memory_space<vmem>>, vector<1x8x128xbf16>
    %65 = vector.shape_cast %64 : vector<1x8x128xbf16> to vector<8x128xbf16>
    %cst_76 = arith.constant dense<0.000000e+00> : vector<120x128xf32>
    %66 = tpu.matmul %63, %65, %cst_76 {dimension_numbers = #tpu.dot_dimension_numbers<[1], [0], [0], [1], [0, 0, 1, 1], [], []>} : vector<120x8xbf16>, vector<8x128xbf16>, vector<120x128xf32> -> vector<120x128xf32>
    %c0_77 = arith.constant 0 : index
    %c0_78 = arith.constant 0 : index
    %67 = vector.load %arg5[%c0_77, %c0_78] : memref<120x128xf32, #tpu.memory_space<vmem>>, vector<120x128xf32>
    %68 = arith.addf %67, %66 : vector<120x128xf32>
    %c0_79 = arith.constant 0 : index
    %c0_80 = arith.constant 0 : index
    %69 = vector.load %arg5[%c0_79, %c0_80] : memref<120x128xf32, #tpu.memory_space<vmem>>, vector<120x128xf32>
    tpu.vector_store %arg5[%c0_79, %c0_80], %68 {strides = array<i32>} : memref<120x128xf32, #tpu.memory_space<vmem>>, vector<120x128xf32>,
    %c0_81 = arith.constant 0 : index
    %c0_82 = arith.constant 0 : index
    %70 = vector.load %arg5[%c0_81, %c0_82] : memref<120x128xf32, #tpu.memory_space<vmem>>, vector<120x128xf32>
    %c0_83 = arith.constant 0 : index
    %c0_84 = arith.constant 0 : index
    %71 = vector.load %arg3[%c0_83, %c0_84] : memref<1x128xf32, #tpu.memory_space<vmem>>, vector<1x128xf32>
    %72 = vector.broadcast %71 : vector<1x128xf32> to vector<120x128xf32>
    %73 = arith.addf %70, %72 : vector<120x128xf32>
    %c0_85 = arith.constant 0 : index
    %c0_86 = arith.constant 0 : index
    %c0_87 = arith.constant 0 : index
    %74 = vector.load %arg4[%c0_85, %c0_86, %c0_87] : memref<1x120x128xf32, #tpu.memory_space<vmem>>, vector<1x120x128xf32>
    %75 = vector.shape_cast %74 : vector<1x120x128xf32> to vector<120x128xf32>
    %76 = vector.shape_cast %73 : vector<120x128xf32> to vector<1x120x128xf32>
    tpu.vector_store %arg4[%c0_85, %c0_86, %c0_87], %76 {strides = array<i32>} : memref<1x120x128xf32, #tpu.memory_space<vmem>>, vector<1x120x128xf32>,
    return
  }
  func.func @transform_0(%arg0: i32) -> (i32, i32, i32) {
    %c0_i32 = arith.constant 0 : i32
    %c0_i32_0 = arith.constant 0 : i32
    %c0_i32_1 = arith.constant 0 : i32
    return %arg0, %c0_i32, %c0_i32_0 : i32, i32, i32
  }
  func.func @transform_1(%arg0: i32) -> (i32, i32, i32) {
    %c0_i32 = arith.constant 0 : i32
    %c0_i32_0 = arith.constant 0 : i32
    %c0_i32_1 = arith.constant 0 : i32
    %c0_i32_2 = arith.constant 0 : i32
    return %c0_i32, %c0_i32_0, %c0_i32_1 : i32, i32, i32
  }
  func.func @transform_2(%arg0: i32) -> (i32, i32) {
    %c0_i32 = arith.constant 0 : i32
    %c0_i32_0 = arith.constant 0 : i32
    %c0_i32_1 = arith.constant 0 : i32
    return %c0_i32, %c0_i32_0 : i32, i32
  }
  func.func @transform_3(%arg0: i32) -> (i32, i32, i32) {
    %c0_i32 = arith.constant 0 : i32
    %c0_i32_0 = arith.constant 0 : i32
    %c0_i32_1 = arith.constant 0 : i32
    return %arg0, %c0_i32, %c0_i32_0 : i32, i32, i32
  }
}

</mosaic_0001>

<bundles_post_ra>
// kernel: tpu_custom_call.1
= control target key start
LH: loop header
LB: loop body
LE: loop exit
PB: predicated region body
PF: predicated region fallthrough
CT: control target
= control target key end

     0   :  { %8 = vsyncpa [#allocation4], 0  ;;  %s3750_s0 = inlined_call_operand.vmem [shape: bf16[2,146,8], index: 0, kind: input, shape index: {}]   ;;  %s3751_s1 = inlined_call_operand.vmem [shape: bf16[9,8,128], index: 1, kind: input, shape index: {}]   ;;  %s3752_s2 = inlined_call_operand.vmem [shape: f32[1,128], index: 2, kind: input, shape index: {}]   ;;  %s3753_s3 = inlined_call_operand.hbm [shape: f32[2,120,128], index: 3, kind: output, shape index: {}]  }
   0x1   :  { %10 = vsyncpa [#allocation4 + $0x1], 0  ;;  %s3176_s12 = smov 0   ;;  %s3178_s13 = smov 0  }
   0x2   :  { %s3180_s14 = smov 0   ;;  %s3182_s15 = smov 0  }
   0x3 LB: > { %s3197_s16 = sadd.s32 4294967295, %s3151_s15   ;;  %s2559_s17 = sadd.s32 4294967294, %s3151_s15   ;;  %s3151_s15 = sphi %s3182_s15, %s3795_s15   ;;  %s3147_s14 = sphi %s3180_s14, %s3794_s14   ;;  %s3143_s13 = sphi %s3178_s13, %s3793_s13   ;;  %s3139_s12 = sphi %s3176_s12, %s3792_s12  }
   0x4   : > { %s3201_s18 = sadd.s32 1, %s3151_s15   ;;  %s91_s19 = sadd.s32 1, %s3147_s14 }
   0x5   : > { %s88_s20 = ssub.s32 %s3151_s15, %s3201_s18  ;;  %p101_p0 = scmp.ne.s32.totalorder %s3147_s14, %s3143_s13 }
   0x6   : > { %p89_p1 = scmp.eq.s32.totalorder %s88_s20, 0  ;;  %p102_p2 = scmp.eq.s32.totalorder %s3197_s16, 1 }
   0x7   : > { %p107_p3 = scmp.ne.s32.totalorder %s3143_s13, %s3139_s12  ;;  %p108_p4 = scmp.eq.s32.totalorder %s2559_s17, 1 }
   0x8   : > { %s3212_s21 = scalar_select %p89_p1, %s3147_s14, %s91_s19  }
   0x9   : > { %p3214_p5 = por %p102_p2, %p101_p0  ;;  %p3218_p6 = por %p108_p4, %p107_p3 }
   0xa   : > { %p2562_p7 = scmp.ge.s32.totalorder %s3151_s15, 1  ;;  %p140_p8 = scmp.lt.s32.totalorder %s3151_s15, 3 }
   0xc   : > { %p141_p9 = pnand %p2562_p7, %p140_p8 }
   0xe   : > { %144 = sbr.rel (%p141_p9) target bundleno = 384 (0x180), region = 32 }
  0x13   : > { %v185_v0 = vld [vmem:[%s3751_s1] sm:$0xf]  ;;  %vm249_vm0 = vcmask 1043456   ;;  %p164_p10 = scmp.lt.s32.totalorder %s3197_s16, 1  ;;  %v2580_v2 = vld [vmem:[%s3751_s1 + $0x4] sm:$0xf] }
  0x14   : > { %2966 = vmatprep.subr.msk.bf16.mxu1 %vm249_vm0, %v185_v0  ;;  %2965 = vmatprep.subr.msk.bf16.mxu0 %vm249_vm0, %v185_v0  ;;  %v251_v1 = vsel %vm249_vm0, %v185_v0, 0  ;;  %v2597_v3 = vld [vmem:[%s3751_s1 + $0x8] sm:$0xf]  ;;  %vm224_vm1 = vcmask 64512   ;;  %v2614_v8 = vld [vmem:[%s3751_s1 + $0xc] sm:$0xf] }
  0x15   : > { %2964 = vmatpush3.bf16.msra.mxu1 %v251_v1  ;;  %2802 = vmatpush3.bf16.msra.mxu0 %v251_v1  ;;  %s165_s30 = scalar_select %p164_p10, %s3197_s16, 1  ;;  %v753_v7 = vsel %vm249_vm0, %v2597_v3, 0  ;;  %v511_v10 = vsel %vm249_vm0, %v2580_v2, 0  ;;  %v2631_v11 = vld [vmem:[%s3751_s1 + $0x10] sm:$0xf]  ;;  %vm712_vm3 = vcmask 1046528  }
  0x16   : > { %2967 = vmatprep.subr.msk.bf16.mxu1 %vm249_vm0, %v2580_v2  ;;  %2968 = vmatprep.subr.msk.bf16.mxu0 %vm249_vm0, %v2597_v3  ;;  %vm422_vm2 = vsmask.f32 7424  ;;  %v995_v18 = vsel %vm249_vm0, %v2614_v8, 0  ;;  %v1293_v25 = vsel %vm249_vm0, %v2631_v11, 0  ;;  %v3291_v49 = vld [vmem:[%s3751_s1 + $0x14] sm:$0xf] }
  0x17   : > { %s2976_s4 = smul.u32 76, %s165_s30  ;;  %v3298_v54 = vld [vmem:[%s3751_s1 + $0x18] sm:$0xf]  ;;  %vm1196_vm4 = vsmask.f32 5376  ;;  %vm954_vm5 = vcmask 1045504  }
  0x18   : > { %vm1494_vm6 = vcmask 1044480   ;;  %s161_s29 = sand.u32 1, %s3143_s13   ;;  %s3153_s19 = smov [#allocation3]  }
  0x19   : > { %s3243_s7 = scalar_lea.vmem %s3750_s0, %s2976_s4  ;;  %s2975_s30 = smul.u32 120, %s161_s29 }
  0x1a   : > { %v3019_v4 = vld [vmem:[%s3243_s7] sm:$0xff]   ;;  %v3021_v6 = vld [vmem:[%s3243_s7 + $0x8] sm:$0xff]   ;;  %v3023_v12 = vld [vmem:[%s3243_s7 + $0x10] sm:$0xff]   ;;  %s3095_s20 = sshll.u32 %s3153_s19, 4  ;;  %s3096_s20 = int_to_ptr.vmem [resolvable:$false] %s3095_s20 }
  0x1b   : > { %v3020_v5 = vld [vmem:[%s3243_s7 + $0x20] sm:$0xff]   ;;  %2803 = vmatprep.mubr.msk.bf16.mxu0 %vm224_vm1, %v3019_v4  ;;  %v3022_v9 = vld [vmem:[%s3243_s7 + $0x28] sm:$0xff]   ;;  %v3024_v13 = vld [vmem:[%s3243_s7 + $0x30] sm:$0xff]   ;;  %s3633_s6 = scalar_lea.vmem [#allocation3], %s2975_s30  ;;  %s3097_s24 = scalar_lea.vmem %s3096_s20, 3840 }
  0x1c   : > { %2811 = vmatprep.mubr.msk.bf16.mxu1 %vm224_vm1, %v3020_v5  ;;  %2804 = vmatmul.mubr.msk.bf16.vlgmr.msra.gmra.mxu0 %vm224_vm1, %v3021_v6  ;;  %v3025_v14 = vld [vmem:[%s3243_s7 + $0x18] sm:$0xff]   ;;  %v3027_v16 = vld [vmem:[%s3243_s7] sm:$0xff]   ;;  %v3028_v17 = vld [vmem:[%s3243_s7 + $0x8] sm:$0xff]   ;;  %s2497_s8 = sshll.u32 %s3633_s6, 4  ;;  %s3704_s8 = int_to_ptr.vmem [resolvable:$true] %s2497_s8 }
  0x1d   : > { %2812 = vmatmul.mubr.msk.bf16.vlgmr.msra.gmra.mxu1 %vm224_vm1, %v3022_v9  ;;  %2838 = vmatpush3.bf16.msra.mxu0 %v753_v7  ;;  %v3026_v15 = vld [vmem:[%s3243_s7 + $0x38] ss:$0 sps:$4 sm:$0xff]   ;;  %v424_v19 = vshrl.u32 %v3027_v16, 16  ;;  %v426_v20 = vshll.u32 %v3027_v16, 16  ;;  %v431_v21 = vshll.u32 %v3028_v17, 16  ;;  %v435_v22 = vshrl.u32 %v3028_v17, 16  ;;  %p3098_p0 = scmp.lt.s32.totalorder %s3704_s8, %s3096_s20 }
  0x1e   : > { %2820 = vmatpush3.bf16.msra.mxu1 %v511_v10  ;;  %2807 = vmatprep.mubr.msk.bf16.mxu0 %vm224_vm1, %v3023_v12  ;;  %v3029_v23 = vld [vmem:[%s3243_s7] sm:$0xfe]   ;;  %v3030_v24 = vld [vmem:[%s3243_s7 + $0x8] sm:$0xff]   ;;  %v3031_v29 = vld [vmem:[%s3243_s7 + $0x10] sm:$0xff]   ;;  %s3091_s17 = scalar_lea.vmem %s3704_s8, 1920 }
  0x1f   : > { %2815 = vmatprep.mubr.msk.bf16.mxu1 %vm224_vm1, %v3024_v13  ;;  %2969 = vmatprep.subr.msk.bf16.mxu1 %vm249_vm0, %v2614_v8  ;;  %v428_v26 = vrot.slane %v426_v20, 1  ;;  %v433_v27 = vrot.slane %v431_v21, 1  ;;  %v713_v28 = vrot.slane %v3029_v23, 1  ;;  %v714_v30 = vrot.slane %v3030_v24, 1  ;;  %v3032_v31 = vld [vmem:[%s3243_s7 + $0x10] sm:$0xff]   ;;  %v3033_v35 = vld [vmem:[%s3243_s7 + $0x18] sm:$0xff]   ;;  %p3092_p11 = scmp.ne.s32.totalorder %s3704_s8, %s3091_s17  ;;  %p3099_p1 = scmp.lt.s32.totalorder %s3097_s24, %s3091_s17 }
  0x20   : > { %2970 = vmatprep.subr.msk.bf16.mxu0 %vm249_vm0, %v2631_v11  ;;  %v439_v34 = vshll.u32 %v3031_v29, 16  ;;  %v443_v36 = vshrl.u32 %v3031_v29, 16  ;;  %v3034_v37 = vld [vmem:[%s3243_s7 + $0x18] sm:$0xff]   ;;  %v716_v39 = vrot.slane %v3032_v31, 1  ;;  %v3035_v40 = vld [vmem:[%s3243_s7 + $0x20] sm:$0xff]   ;;  %v447_v43 = vshll.u32 %v3033_v35, 16 }
  0x21   : > { %v429_v32 = vor.u32 %v428_v26, %v424_v19  ;;  %v437_v33 = vor.u32 %v435_v22, %v433_v27  ;;  %v715_v38 = vsel %vm712_vm3, %v713_v28, %v714_v30  ;;  %v718_v44 = vrot.slane %v3034_v37, 1  ;;  %v3036_v45 = vld [vmem:[%s3243_s7 + $0x20] sm:$0xff]   ;;  %v3037_v53 = vld [vmem:[%s3243_s7 + $0x28] sm:$0xff]   ;;  %v3039_v62 = vld [vmem:[%s3243_s7 + $0x30] sm:$0xff]   ;;  %p3093_p12 = pnand %p3092_p11, %p3214_p5  ;;  %p3100_p2 = por %p3099_p1, %p3098_p0 }
  0x22   : > { %v441_v42 = vrot.slane %v439_v34, 1  ;;  %v717_v46 = vsel %vm712_vm3, %v714_v30, %v716_v39  ;;  %v451_v47 = vshrl.u32 %v3033_v35, 16  ;;  %v455_v48 = vshll.u32 %v3035_v40, 16  ;;  %v3038_v59 = vld [vmem:[%s3243_s7 + $0x28] sm:$0xff]   ;;  %v3040_v5 = vld [vmem:[%s3243_s7 + $0x30] sm:$0xff]  }
  0x23   : > { %v434_v41 = vsel %vm422_vm2, %v429_v32, %v433_v27  ;;  %v449_v52 = vrot.slane %v447_v43, 1  ;;  %v719_v55 = vsel %vm712_vm3, %v716_v39, %v718_v44  ;;  %v720_v57 = vrot.slane %v3036_v45, 1  ;;  %v3041_v6 = vld [vmem:[%s3243_s7 + $0x38] sm:$0x1f]   ;;  %v3046_v11 = vld [vmem:[%s3243_s7 + $0xc] sm:$0xff]   ;;  %v3052_v45 = vld [vmem:[%s3243_s7 + $0x24] sm:$0xff]   ;;  %p3094_p13 = pneg %p3093_p12 }
  0x24   : > { %2808 = vmatmul.mubr.msk.bf16.gmra.mxu0 %vm224_vm1, %v3025_v14  ;;  %v442_v50 = vsel %vm422_vm2, %v437_v33, %v441_v42  ;;  %v445_v51 = vor.u32 %v443_v36, %v441_v42  ;;  %v457_v56 = vrot.slane %v455_v48, 1  ;;  %v459_v58 = vshrl.u32 %v3035_v40, 16  ;;  %v3042_v10 = vld [vmem:[%s3243_s7 + $0x38] sm:$0x1f]   ;;  %v3045_v22 = vld [vmem:[%s3243_s7 + $0x4] sm:$0xfc]  }
  0x25   : > { %2816 = vmatmul.mubr.msk.bf16.gmra.mxu1 %vm224_vm1, %v3026_v15  ;;  %2839 = vmatprep.mubr.msk.bf16.mxu0 %vm224_vm1, %v715_v38  ;;  %v463_v61 = vshll.u32 %v3037_v53, 16  ;;  %v453_v63 = vor.u32 %v451_v47, %v449_v52  ;;  %v722_v0 = vrot.slane %v3038_v59, 1  ;;  %v721_v3 = vsel %vm712_vm3, %v718_v44, %v720_v57  ;;  %v3048_v28 = vld [vmem:[%s3243_s7 + $0x14] sm:$0xff]   ;;  %v3043_v34 = vld [vmem:[%s3243_s7 + $0x4] sm:$0xfc]   ;;  %v3050_v38 = vld [vmem:[%s3243_s7 + $0x1c] sm:$0xff]   ;;  %p3101_p3 = pnand %p3100_p2, %p3094_p13 }
  0x26   : > { %2821 = vmatprep.mubr.msk.bf16.mxu1 %vm224_vm1, %v434_v41  ;;  %v450_v60 = vsel %vm422_vm2, %v445_v51, %v449_v52  ;;  %v461_v1 = vor.u32 %v459_v58, %v457_v56  ;;  %v471_v4 = vshll.u32 %v3039_v62, 16  ;;  %v467_v9 = vshrl.u32 %v3037_v53, 16  ;;  %v3054_v52 = vld [vmem:[%s3243_s7 + $0x2c] sm:$0xff]  }
  0x27   : > { %v465_v2 = vrot.slane %v463_v61, 1  ;;  %v458_v7 = vsel %vm422_vm2, %v453_v63, %v457_v56  ;;  %v723_v8 = vsel %vm712_vm3, %v720_v57, %v722_v0  ;;  %v475_v13 = vshrl.u32 %v3039_v62, 16  ;;  %v3049_v57 = vld [vmem:[%s3243_s7 + $0x1c] sm:$0xff]  }
  0x28   : > { %v479_v14 = vshll.u32 %v3041_v6, 16  ;;  %v473_v15 = vrot.slane %v471_v4, 1  ;;  %v724_v16 = vrot.slane %v3040_v5, 1  ;;  %v726_v17 = vrot.slane %v3042_v10, 1  ;;  %v3051_v5 = vld [vmem:[%s3243_s7 + $0x24] sm:$0xff]  }
  0x29   : > { %v466_v12 = vsel %vm422_vm2, %v461_v1, %v465_v2  ;;  %v469_v19 = vor.u32 %v467_v9, %v465_v2  ;;  %v1209_v23 = vshll.u32 %v3046_v11, 16  ;;  %v1198_v26 = vshrl.u32 %v3045_v22, 16 }
  0x2a   : > { %v477_v20 = vor.u32 %v475_v13, %v473_v15  ;;  %v481_v21 = vrot.slane %v479_v14, 1  ;;  %v725_v24 = vsel %vm712_vm3, %v722_v0, %v724_v16  ;;  %v1201_v27 = vshll.u32 %v3045_v22, 16  ;;  %v3058_v13 = vld [vmem:[%s3243_s7 + $0x3c] sm:$0x7f]  }
  0x2b   : > { %v474_v29 = vsel %vm422_vm2, %v469_v19, %v473_v15  ;;  %v727_v30 = vsel %vm712_vm3, %v724_v16, %v726_v17  ;;  %v1211_v32 = vrot.slane %v1209_v23, 3  ;;  %v1200_v35 = vrot.slane %v1198_v26, 2  ;;  %v3357_v14 = vld [vmem:[%s3751_s1 + $0x1c] sm:$0xf]  ;;  %v3053_v16 = vld [vmem:[%s3243_s7 + $0x2c] sm:$0xff]   ;;  %v3055_v26 = vld [vmem:[%s3243_s7 + $0x34] sm:$0xff]  }
  0x2c   : > { %2840 = vmatmul.mubr.msk.bf16.vlgmr.msra.gmra.mxu0 %vm224_vm1, %v717_v46  ;;  %v482_v33 = vsel %vm422_vm2, %v477_v20, %v481_v21  ;;  %v1203_v36 = vrot.slane %v1201_v27, 3  ;;  %v1215_v37 = vshrl.u32 %v3048_v28, 16  ;;  %v483_v39 = vshrl.u32 %v3041_v6, 16 }
  0x2d   : > { %2822 = vmatmul.mubr.msk.bf16.vlgmr.msra.gmra.mxu1 %vm224_vm1, %v442_v50  ;;  %2874 = vmatpush3.bf16.msra.mxu0 %v1293_v25  ;;  %v3044_v25 = vld [vmem:[%s3243_s7 + $0xc] sm:$0xff]   ;;  %v1218_v40 = vshll.u32 %v3048_v28, 16  ;;  %v955_v44 = vrot.slane %v3043_v34, 2  ;;  %v1224_v47 = vshrl.u32 %v3050_v38, 16  ;;  %v1227_v48 = vshll.u32 %v3050_v38, 16 }
  0x2e   : > { %2856 = vmatpush3.bf16.msra.mxu1 %v995_v18  ;;  %2825 = vmatprep.mubr.msk.bf16.mxu1 %vm224_vm1, %v450_v60  ;;  %v1206_v18 = vshrl.u32 %v3046_v11, 16  ;;  %v956_v41 = vrot.slane %v3044_v25, 2  ;;  %v1204_v42 = vor.u32 %v1203_v36, %v1200_v35  ;;  %v1217_v46 = vrot.slane %v1215_v37, 2  ;;  %v3056_v11 = vld [vmem:[%s3243_s7 + $0x34] sm:$0xff]   ;;  %v3057_v35 = vld [vmem:[%s3243_s7 + $0x3c] sm:$0x3f]  }
  0x2f   : > { %2843 = vmatprep.mubr.msk.bf16.mxu0 %vm224_vm1, %v719_v55  ;;  %2971 = vmatprep.subr.msk.bf16.mxu1 %vm249_vm0, %v3291_v49  ;;  %v485_v50 = vor.u32 %v483_v39, %v481_v21  ;;  %v1220_v51 = vrot.slane %v1218_v40, 3  ;;  %v3047_v55 = vld [vmem:[%s3243_s7 + $0x14] sm:$0xff]   ;;  %v1233_v58 = vshrl.u32 %v3052_v45, 16  ;;  %v1226_v59 = vrot.slane %v1224_v47, 2 }
  0x30   : > { %2972 = vmatprep.subr.msk.bf16.mxu0 %vm249_vm0, %v3298_v54  ;;  %v1208_v31 = vrot.slane %v1206_v18, 2  ;;  %v957_v56 = vsel %vm954_vm5, %v955_v44, %v956_v41  ;;  %v1229_v60 = vrot.slane %v1227_v48, 3  ;;  %v1236_v62 = vshll.u32 %v3052_v45, 16  ;;  %v3059_v44 = vld [vmem:[%s3243_s7 + $0x4] sm:$0xf8]   ;;  %v3060_v45 = vld [vmem:[%s3243_s7 + $0xc] sm:$0xff]  }
  0x31   : > { %v1221_v61 = vor.u32 %v1220_v51, %v1217_v46  ;;  %v1242_v63 = vshrl.u32 %v3054_v52, 16  ;;  %v1245_v0 = vshll.u32 %v3054_v52, 16  ;;  %v958_v1 = vrot.slane %v3047_v55, 2  ;;  %v3061_v48 = vld [vmem:[%s3243_s7 + $0xc] sm:$0xff]   ;;  %v3064_v51 = vld [vmem:[%s3243_s7 + $0x1c] sm:$0xff]  }
  0x32   : > { %v1212_v43 = vor.u32 %v1211_v32, %v1208_v31  ;;  %v1758_v2 = vsel %vm249_vm0, %v3298_v54, 0  ;;  %v1230_v4 = vor.u32 %v1229_v60, %v1226_v59  ;;  %v1235_v6 = vrot.slane %v1233_v58, 2  ;;  %v3066_v59 = vld [vmem:[%s3243_s7 + $0x24] sm:$0xff]  }
  0x33   : > { %v1244_v9 = vrot.slane %v1242_v63, 2  ;;  %v1247_v10 = vrot.slane %v1245_v0, 3  ;;  %v1535_v54 = vsel %vm249_vm0, %v3291_v49, 0  ;;  %v962_v19 = vrot.slane %v3051_v5, 2  ;;  %v3068_v63 = vld [vmem:[%s3243_s7 + $0x2c] sm:$0xff]   ;;  %v3070_v5 = vld [vmem:[%s3243_s7 + $0x34] sm:$0xff]  }
  0x34   : > { %2844 = vmatmul.mubr.msk.bf16.gmra.mxu0 %vm224_vm1, %v721_v3  ;;  %v1213_v53 = vsel %vm1196_vm4, %v1204_v42, %v1212_v43  ;;  %v960_v3 = vrot.slane %v3049_v57, 2  ;;  %v1231_v18 = vsel %vm1196_vm4, %v1221_v61, %v1230_v4  ;;  %v1251_v21 = vshrl.u32 %v3056_v11, 16 }
  0x35   : > { %2826 = vmatmul.mubr.msk.bf16.gmra.mxu1 %vm224_vm1, %v458_v7  ;;  %2847 = vmatprep.mubr.msk.bf16.mxu0 %vm224_vm1, %v723_v8  ;;  %v1222_v7 = vsel %vm1196_vm4, %v1212_v43, %v1221_v61  ;;  %v1238_v8 = vrot.slane %v1236_v62, 3  ;;  %v1254_v22 = vshll.u32 %v3056_v11, 16  ;;  %v1248_v49 = vor.u32 %v1247_v10, %v1244_v9  ;;  %v3065_v62 = vld [vmem:[%s3243_s7 + $0x1c] sm:$0xff]   ;;  %v3076_v11 = vld [vmem:[%s3243_s7 + $0x14] sm:$0xff]  }
  0x36   : > { %2829 = vmatprep.mubr.msk.bf16.mxu1 %vm224_vm1, %v466_v12  ;;  %v959_v12 = vsel %vm954_vm5, %v956_v41, %v958_v1  ;;  %v961_v15 = vsel %vm954_vm5, %v958_v1, %v960_v3  ;;  %v1260_v23 = vshrl.u32 %v3058_v13, 16  ;;  %v964_v25 = vrot.slane %v3053_v16, 2  ;;  %v3078_v16 = vld [vmem:[%s3243_s7 + $0x14] sm:$0xff]  }
  0x37   : > { %v1239_v20 = vor.u32 %v1238_v8, %v1235_v6  ;;  %v1253_v28 = vrot.slane %v1251_v21, 2  ;;  %v966_v37 = vrot.slane %v3055_v26, 2  ;;  %v968_v39 = vrot.slane %v3057_v35, 2  ;;  %v3075_v8 = vld [vmem:[%s3243_s7 + $0xc] sm:$0xff]   ;;  %v3079_v21 = vld [vmem:[%s3243_s7 + $0x1c] sm:$0xff]  }
  0x38   : > { %v1262_v32 = vrot.slane %v1260_v23, 2  ;;  %v965_v34 = vsel %vm954_vm5, %v962_v19, %v964_v25  ;;  %v1495_v46 = vrot.slane %v3059_v44, 3  ;;  %v1496_v47 = vrot.slane %v3060_v45, 3  ;;  %v3074_v26 = vld [vmem:[%s3243_s7 + $0x44] ss:$0 sps:$4 sm:$0xff]   ;;  %v3084_v45 = vld [vmem:[%s3243_s7 + $0x2c] sm:$0xff]  }
  0x39   : > { %v1240_v27 = vsel %vm1196_vm4, %v1230_v4, %v1239_v20  ;;  %v1249_v31 = vsel %vm1196_vm4, %v1239_v20, %v1248_v49  ;;  %v967_v41 = vsel %vm954_vm5, %v964_v25, %v966_v37  ;;  %v969_v43 = vsel %vm954_vm5, %v966_v37, %v968_v39  ;;  %v3081_v25 = vld [vmem:[%s3243_s7 + $0x24] sm:$0xff]   ;;  %v3083_v37 = vld [vmem:[%s3243_s7 + $0x2c] sm:$0xff]  }
  0x3a   : > { %v1497_v52 = vsel %vm1494_vm6, %v1495_v46, %v1496_v47  ;;  %v1500_v55 = vrot.slane %v3064_v51, 3  ;;  %v2047_v60 = vsel %vm249_vm0, %v3357_v14, 0  ;;  %v1502_v0 = vrot.slane %v3066_v59, 3 }
  0x3b   : > { %v1504_v1 = vrot.slane %v3068_v63, 3  ;;  %v1506_v9 = vrot.slane %v3070_v5, 3  ;;  %v1967_v20 = vshll.u32 %v3076_v11, 16  ;;  %v1991_v44 = vshll.u32 %v3083_v37, 16  ;;  %v3090_v5 = vld [vmem:[%s3243_s7 + $0x44] sm:$0x1f]  }
  0x3c   : > { %2848 = vmatmul.mubr.msk.bf16.gmra.mxu0 %vm224_vm1, %v725_v24  ;;  %v1263_v24 = vshll.u32 %v3058_v13, 16  ;;  %v1503_v4 = vsel %vm1494_vm6, %v1500_v55, %v1502_v0  ;;  %v3071_v13 = vld [vmem:[%s3243_s7 + $0x34] sm:$0xff]  }
  0x3d   : > { %2830 = vmatmul.mubr.msk.bf16.gmra.mxu1 %vm224_vm1, %v474_v29  ;;  %2851 = vmatprep.mubr.msk.bf16.mxu0 %vm224_vm1, %v727_v30  ;;  %v1256_v29 = vrot.slane %v1254_v22, 3  ;;  %v963_v30 = vsel %vm954_vm5, %v960_v3, %v962_v19  ;;  %v3069_v3 = vld [vmem:[%s3243_s7 + $0x2c] sm:$0xff]   ;;  %v1505_v6 = vsel %vm1494_vm6, %v1502_v0, %v1504_v1 }
  0x3e   : > { %2833 = vmatprep.mubr.msk.bf16.mxu1 %vm224_vm1, %v482_v33  ;;  %v1265_v33 = vrot.slane %v1263_v24, 3  ;;  %v1969_v24 = vrot.slane %v1967_v20, 1 }
  0x3f   : > { %v1257_v36 = vor.u32 %v1256_v29, %v1253_v28  ;;  %v3080_v28 = vld [vmem:[%s3243_s7 + $0x1c] sm:$0xff]   ;;  %v1971_v29 = vshrl.u32 %v3076_v11, 16 }
  0x40   : > { %v1266_v38 = vor.u32 %v1265_v33, %v1262_v32  ;;  %v1979_v33 = vshrl.u32 %v3079_v21, 16 }
  0x41   : > { %v1258_v40 = vsel %vm1196_vm4, %v1248_v49, %v1257_v36  ;;  %v2249_v49 = vrot.slane %v3078_v16, 1 }
  0x42   : > { %v1267_v42 = vsel %vm1196_vm4, %v1257_v36, %v1266_v38  ;;  %v2251_v36 = vrot.slane %v3080_v28, 1 }
  0x44   : > { %2852 = vmatmul.mubr.msk.bf16.gmra.mxu0 %vm224_vm1, %v726_v17  ;;  %v2699_v17 = vld [vmem:[%s3751_s1 + $0x20] sm:$0xf] }
  0x45   : > { %2834 = vmatmul.mubr.msk.bf16.gmra.mxu1 %vm224_vm1, %v485_v50  ;;  %2875 = vmatprep.mubr.msk.bf16.mxu0 %vm224_vm1, %v1213_v53  ;;  %v3062_v50 = vld [vmem:[%s3243_s7 + $0x14] sm:$0xff]   ;;  %v2288_v58 = vsel %vm249_vm0, %v2699_v17, 0 }
  0x46   : > { %2857 = vmatprep.mubr.msk.bf16.mxu1 %vm224_vm1, %v957_v56  ;;  %v1498_v53 = vrot.slane %v3062_v50, 3  ;;  %v3063_v56 = vld [vmem:[%s3243_s7 + $0x14] sm:$0xff]  }
  0x47   : > { %v3086_v50 = vld [vmem:[%s3243_s7 + $0x34] sm:$0xff]  }
  0x48   : > { %v1499_v57 = vsel %vm1494_vm6, %v1496_v47, %v1498_v53  ;;  %v1501_v61 = vsel %vm1494_vm6, %v1498_v53, %v1500_v55  ;;  %v1993_v55 = vrot.slane %v1991_v44, 1  ;;  %v2257_v59 = vrot.slane %v3086_v50, 1 }
  0x4c   : > { %2876 = vmatmul.mubr.msk.bf16.vlgmr.msra.gmra.mxu0 %vm224_vm1, %v1222_v7  ;;  %v3072_v7 = vld [vmem:[%s3243_s7 + $0x3c] sm:$0x7f]  }
  0x4d   : > { %2858 = vmatmul.mubr.msk.bf16.vlgmr.msra.gmra.mxu1 %vm224_vm1, %v959_v12  ;;  %2910 = vmatpush3.bf16.msra.mxu0 %v1758_v2  ;;  %v3067_v2 = vld [vmem:[%s3243_s7 + $0x24] sm:$0xff]   ;;  %v1508_v10 = vrot.slane %v3072_v7, 3  ;;  %v1962_v12 = vshll.u32 %v3075_v8, 16 }
  0x4e   : > { %2892 = vmatpush3.bf16.msra.mxu1 %v1535_v54  ;;  %2861 = vmatprep.mubr.msk.bf16.mxu1 %vm224_vm1, %v961_v15  ;;  %v1507_v54 = vsel %vm1494_vm6, %v1504_v1, %v1506_v9  ;;  %v3077_v15 = vld [vmem:[%s3243_s7 + $0xc] sm:$0xfe]   ;;  %v3088_v1 = vld [vmem:[%s3243_s7 + $0x3c] sm:$0xff]  }
  0x4f   : > { %2879 = vmatprep.mubr.msk.bf16.mxu0 %vm224_vm1, %v1231_v18  ;;  %2973 = vmatprep.subr.msk.bf16.mxu1 %vm249_vm0, %v3357_v14  ;;  %v3073_v14 = vld [vmem:[%s3243_s7 + $0x3c] sm:$0xff]   ;;  %v1960_v18 = vshrl.u32 %v3075_v8, 16  ;;  %v1964_v19 = vrot.slane %v1962_v12, 1  ;;  %v2248_v22 = vrot.slane %v3077_v15, 1  ;;  %v2261_v12 = vrot.slane %v3090_v5, 1 }
  0x50   : > { %2974 = vmatprep.subr.msk.bf16.mxu0 %vm249_vm0, %v2699_v17  ;;  %v1509_v17 = vsel %vm1494_vm6, %v1506_v9, %v1508_v10 }
  0x51   : > { %v1965_v23 = vor.u32 %v1964_v19, %v1960_v18 }
  0x53   : > { %v1970_v32 = vsel %vm422_vm2, %v1965_v23, %v1969_v24 }
  0x54   : > { %2880 = vmatmul.mubr.msk.bf16.gmra.mxu0 %vm224_vm1, %v1240_v27  ;;  %v1975_v27 = vshll.u32 %v3079_v21, 16 }
  0x55   : > { %2862 = vmatmul.mubr.msk.bf16.gmra.mxu1 %vm224_vm1, %v963_v30  ;;  %2883 = vmatprep.mubr.msk.bf16.mxu0 %vm224_vm1, %v1249_v31  ;;  %v2250_v30 = vsel %vm712_vm3, %v2248_v22, %v2249_v49  ;;  %v3082_v31 = vld [vmem:[%s3243_s7 + $0x24] sm:$0xff]  }
  0x56   : > { %2865 = vmatprep.mubr.msk.bf16.mxu1 %vm224_vm1, %v965_v34  ;;  %v1983_v34 = vshll.u32 %v3081_v25, 16  ;;  %v1977_v35 = vrot.slane %v1975_v27, 1 }
  0x5c   : > { %2884 = vmatmul.mubr.msk.bf16.gmra.mxu0 %vm224_vm1, %v1258_v40  ;;  %v1981_v40 = vor.u32 %v1979_v33, %v1977_v35 }
  0x5d   : > { %2866 = vmatmul.mubr.msk.bf16.gmra.mxu1 %vm224_vm1, %v967_v41  ;;  %2887 = vmatprep.mubr.msk.bf16.mxu0 %vm224_vm1, %v1267_v42  ;;  %v1985_v41 = vrot.slane %v1983_v34, 1  ;;  %v3085_v42 = vld [vmem:[%s3243_s7 + $0x34] sm:$0xff]  }
  0x5e   : > { %2869 = vmatprep.mubr.msk.bf16.mxu1 %vm224_vm1, %v969_v43  ;;  %v2252_v43 = vsel %vm712_vm3, %v2249_v49, %v2251_v36  ;;  %v1999_v53 = vshll.u32 %v3085_v42, 16 }
  0x5f   : > { %v1986_v51 = vsel %vm422_vm2, %v1981_v40, %v1985_v41 }
  0x64   : > { %2888 = vmatmul.mubr.msk.bf16.gmra.mxu0 %vm224_vm1, %v1266_v38  ;;  %v1973_v38 = vor.u32 %v1971_v29, %v1969_v24 }
  0x65   : > { %2870 = vmatmul.mubr.msk.bf16.gmra.mxu1 %vm224_vm1, %v968_v39  ;;  %2911 = vmatprep.mubr.msk.bf16.mxu0 %vm224_vm1, %v3061_v48  ;;  %v2253_v39 = vrot.slane %v3082_v31, 1  ;;  %v1987_v48 = vshrl.u32 %v3081_v25, 16 }
  0x66   : > { %2893 = vmatprep.mubr.msk.bf16.mxu1 %vm224_vm1, %v1497_v52  ;;  %v1978_v46 = vsel %vm422_vm2, %v1973_v38, %v1977_v35  ;;  %v1995_v52 = vshrl.u32 %v3083_v37, 16 }
  0x67   : > { %v2254_v47 = vsel %vm712_vm3, %v2251_v36, %v2253_v39 }
  0x6c   : > { %2912 = vmatmul.mubr.msk.bf16.vlgmr.msra.gmra.mxu0 %vm224_vm1, %v3063_v56  ;;  %v2255_v56 = vrot.slane %v3084_v45, 1 }
  0x6d   : > { %2894 = vmatmul.mubr.msk.bf16.vlgmr.msra.gmra.mxu1 %vm224_vm1, %v1499_v57  ;;  %2946 = vmatpush3.bf16.msra.mxu0 %v2288_v58  ;;  %v3087_v57 = vld [vmem:[%s3243_s7 + $0x3c] sm:$0xff]   ;;  %v1989_v58 = vor.u32 %v1987_v48, %v1985_v41 }
  0x6e   : > { %2928 = vmatpush3.bf16.msra.mxu1 %v2047_v60  ;;  %2897 = vmatprep.mubr.msk.bf16.mxu1 %vm224_vm1, %v1501_v61  ;;  %v1997_v60 = vor.u32 %v1995_v52, %v1993_v55  ;;  %v2001_v61 = vrot.slane %v1999_v53, 1  ;;  %v2256_v63 = vsel %vm712_vm3, %v2253_v39, %v2255_v56  ;;  %v2007_v0 = vshll.u32 %v3087_v57, 16 }
  0x6f   : > { %2915 = vmatprep.mubr.msk.bf16.mxu0 %vm224_vm1, %v3065_v62  ;;  %v3089_v62 = vld [vmem:[%s3243_s7 + $0x44] sm:$0x1f]   ;;  %v2011_v7 = vshrl.u32 %v3087_v57, 16  ;;  %s2977_s7 = smul.u32 1920, %s3197_s16  ;;  %s3710_s16 = scalar_lea.sflag [#allocation4], %s161_s29 }
  0x70   : > { %v2015_v8 = vshll.u32 %v3089_v62, 16  ;;  %v2009_v9 = vrot.slane %v2007_v0, 1  ;;  %v2019_v18 = vshrl.u32 %v3089_v62, 16 }
  0x71   : > { %s3702_s11 = scalar_lea.hbm %s3753_s3, %s2977_s7 }
  0x74   : > { %2916 = vmatmul.mubr.msk.bf16.gmra.mxu0 %vm224_vm1, %v3067_v2  ;;  %v1994_v2 = vsel %vm422_vm2, %v1989_v58, %v1993_v55 }
  0x75   : > { %2898 = vmatmul.mubr.msk.bf16.gmra.mxu1 %vm224_vm1, %v1503_v4  ;;  %2919 = vmatprep.mubr.msk.bf16.mxu0 %vm224_vm1, %v3069_v3  ;;  %v2258_v3 = vsel %vm712_vm3, %v2255_v56, %v2257_v59  ;;  %v2003_v4 = vshrl.u32 %v3085_v42, 16 }
  0x76   : > { %2901 = vmatprep.mubr.msk.bf16.mxu1 %vm224_vm1, %v1505_v6  ;;  %v2002_v6 = vsel %vm422_vm2, %v1997_v60, %v2001_v61 }
  0x77   : > { %v2005_v11 = vor.u32 %v2003_v4, %v2001_v61 }
  0x79   : > { %v2010_v15 = vsel %vm422_vm2, %v2005_v11, %v2009_v9 }
  0x7c   : > { %2920 = vmatmul.mubr.msk.bf16.gmra.mxu0 %vm224_vm1, %v3071_v13  ;;  %v2013_v13 = vor.u32 %v2011_v7, %v2009_v9 }
  0x7d   : > { %2902 = vmatmul.mubr.msk.bf16.gmra.mxu1 %vm224_vm1, %v1507_v54  ;;  %2923 = vmatprep.mubr.msk.bf16.mxu0 %vm224_vm1, %v3073_v14  ;;  %v2017_v14 = vrot.slane %v2015_v8, 1 }
  0x7e   : > { %2905 = vmatprep.mubr.msk.bf16.mxu1 %vm224_vm1, %v1509_v17 }
  0x7f   : > { %v2018_v17 = vsel %vm422_vm2, %v2013_v13, %v2017_v14  ;;  %v2021_v19 = vor.u32 %v2019_v18, %v2017_v14 }
  0x84   : > { %2924 = vmatmul.mubr.msk.bf16.gmra.mxu0 %vm224_vm1, %v3074_v26 }
  0x85   : > { %2906 = vmatmul.mubr.msk.bf16.gmra.mxu1 %vm224_vm1, %v1508_v10  ;;  %2947 = vmatprep.mubr.msk.bf16.mxu0 %vm224_vm1, %v2250_v30  ;;  %v2259_v10 = vrot.slane %v3088_v1, 1 }
  0x86   : > { %2929 = vmatprep.mubr.msk.bf16.mxu1 %vm224_vm1, %v1970_v32 }
  0x87   : > { %v2260_v54 = vsel %vm712_vm3, %v2257_v59, %v2259_v10  ;;  %v2262_v16 = vsel %vm712_vm3, %v2259_v10, %v2261_v12 }
  0x8c   : > { %2948 = vmatmul.mubr.msk.bf16.vlgmr.msra.gmra.mxu0 %vm224_vm1, %v2252_v43 }
  0x8d   : > { %2930 = vmatmul.mubr.msk.bf16.vlgmr.msra.gmra.mxu1 %vm224_vm1, %v1978_v46  ;;  %2951 = vmatprep.mubr.msk.bf16.mxu0 %vm224_vm1, %v2254_v47 }
  0x8e   : > { %2933 = vmatprep.mubr.msk.bf16.mxu1 %vm224_vm1, %v1986_v51 }
  0x94   : > { %2952 = vmatmul.mubr.msk.bf16.gmra.mxu0 %vm224_vm1, %v2256_v63 }
  0x95   : > { %2934 = vmatmul.mubr.msk.bf16.gmra.mxu1 %vm224_vm1, %v1994_v2  ;;  %2955 = vmatprep.mubr.msk.bf16.mxu0 %vm224_vm1, %v2258_v3 }
  0x96   : > { %2937 = vmatprep.mubr.msk.bf16.mxu1 %vm224_vm1, %v2002_v6 }
  0x9c   : > { %2956 = vmatmul.mubr.msk.bf16.gmra.mxu0 %vm224_vm1, %v2260_v54 }
  0x9d   : > { %2938 = vmatmul.mubr.msk.bf16.gmra.mxu1 %vm224_vm1, %v2010_v15  ;;  %2959 = vmatprep.mubr.msk.bf16.mxu0 %vm224_vm1, %v2262_v16 }
  0x9e   : > { %2941 = vmatprep.mubr.msk.bf16.mxu1 %vm224_vm1, %v2018_v17 }
  0xa4   : > { %2960 = vmatmul.mubr.msk.bf16.gmra.mxu0 %vm224_vm1, %v2261_v12 }
  0xa5   : > { %2942 = vmatmul.mubr.msk.bf16.gmra.mxu1 %vm224_vm1, %v2021_v19 }
  0xdc   : > { %v2805_v20 = vpop.f32.mrf.mxu0 }
  0xdd   : > { %v2813_v21 = vpop.f32.mrf.mxu1 }
  0xde   : > { %v287_v22 = vpop.f32.mrf.mxu0 }
  0xdf   : > { %v319_v49 = vpop.f32.mrf.mxu1 }
  0xe0   : > { %v2806_v23 = vpop.f32.mrf.mxu0 }
  0xe1   : > { %v2814_v24 = vpop.f32.mrf.mxu1 }
  0xe2   : > { %v290_v25 = vpop.f32.mrf.mxu0 }
  0xe3   : > { %v322_v26 = vpop.f32.mrf.mxu1 }
  0xe4   : > { %v2809_v27 = vpop.f32.mrf.mxu0 }
  0xe5   : > { %v2817_v28 = vpop.f32.mrf.mxu1 }
  0xe6   : > { %v303_v29 = vpop.f32.mrf.mxu0 }
  0xe7   : > { %v335_v30 = vpop.f32.mrf.mxu1 }
  0xe8   : > { %v2810_v31 = vpop.f32.mrf.mxu0 }
  0xe9   : > { %v2818_v32 = vpop.f32.mrf.mxu1 }
  0xea   : > { %v306_v33 = vpop.f32.mrf.mxu0 }
  0xeb   : > { %v338_v34 = vpop.f32.mrf.mxu1 }
  0xec   : > { %v2841_v35 = vpop.f32.mrf.mxu0 }
  0xed   : > { %v2823_v36 = vpop.f32.mrf.mxu1 }
  0xee   : > { %v626_v37 = vadd.f32 %v2823_v36, %v2805_v20  ;;  %v789_v38 = vpop.f32.mrf.mxu0 }
  0xef   : > { %v547_v39 = vpop.f32.mrf.mxu1 }
  0xf0   : > { %v3482_v40 = vadd.f32 %v2841_v35, %v626_v37  ;;  %v624_v41 = vadd.f32 %v547_v39, %v287_v22  ;;  %v2842_v42 = vpop.f32.mrf.mxu0 }
  0xf1   : > { %v2824_v43 = vpop.f32.mrf.mxu1 }
  0xf2   : > { %v3484_v44 = vadd.f32 %v789_v38, %v624_v41  ;;  %v627_v45 = vadd.f32 %v2824_v43, %v2806_v23  ;;  %v792_v46 = vpop.f32.mrf.mxu0 }
  0xf3   : > { %v550_v47 = vpop.f32.mrf.mxu1 }
  0xf4   : > { %v3486_v48 = vadd.f32 %v2842_v42, %v627_v45  ;;  %v625_v50 = vadd.f32 %v550_v47, %v290_v25  ;;  %v2845_v51 = vpop.f32.mrf.mxu0 }
  0xf5   : > { %v2827_v52 = vpop.f32.mrf.mxu1 }
  0xf6   : > { %v3488_v53 = vadd.f32 %v792_v46, %v625_v50  ;;  %v630_v55 = vadd.f32 %v2827_v52, %v2809_v27  ;;  %v805_v56 = vpop.f32.mrf.mxu0 }
  0xf7   : > { %v563_v57 = vpop.f32.mrf.mxu1 }
  0xf8   : > { %v3490_v58 = vadd.f32 %v2845_v51, %v630_v55  ;;  %v628_v59 = vadd.f32 %v563_v57, %v303_v29  ;;  %v2846_v60 = vpop.f32.mrf.mxu0 }
  0xf9   : > { %v2828_v61 = vpop.f32.mrf.mxu1 }
  0xfa   : > { %v3492_v62 = vadd.f32 %v805_v56, %v628_v59  ;;  %v631_v63 = vadd.f32 %v2828_v61, %v2810_v31  ;;  %v808_v0 = vpop.f32.mrf.mxu0 }
  0xfb   : > { %v566_v1 = vpop.f32.mrf.mxu1 }
  0xfc   : > { %v3494_v2 = vadd.f32 %v2846_v60, %v631_v63  ;;  %v629_v3 = vadd.f32 %v566_v1, %v306_v33  ;;  %v2849_v4 = vpop.f32.mrf.mxu0 }
  0xfd   : > { %v2831_v5 = vpop.f32.mrf.mxu1 }
  0xfe   : > { %v3496_v6 = vadd.f32 %v808_v0, %v629_v3  ;;  %v634_v7 = vadd.f32 %v2831_v5, %v2813_v21  ;;  %v821_v8 = vpop.f32.mrf.mxu0 }
  0xff   : > { %v579_v9 = vpop.f32.mrf.mxu1 }
 0x100   : > { %v3498_v10 = vadd.f32 %v2849_v4, %v634_v7  ;;  %v632_v11 = vadd.f32 %v579_v9, %v319_v49  ;;  %v2850_v12 = vpop.f32.mrf.mxu0 }
 0x101   : > { %v2832_v13 = vpop.f32.mrf.mxu1 }
 0x102   : > { %v3500_v14 = vadd.f32 %v821_v8, %v632_v11  ;;  %v635_v54 = vadd.f32 %v2832_v13, %v2814_v24  ;;  %v824_v15 = vpop.f32.mrf.mxu0 }
 0x103   : > { %v582_v16 = vpop.f32.mrf.mxu1 }
 0x104   : > { %v3502_v17 = vadd.f32 %v2850_v12, %v635_v54  ;;  %v633_v18 = vadd.f32 %v582_v16, %v322_v26  ;;  %v2853_v19 = vpop.f32.mrf.mxu0 }
 0x105   : > { %v2835_v20 = vpop.f32.mrf.mxu1 }
 0x106   : > { %v3504_v22 = vadd.f32 %v824_v15, %v633_v18  ;;  %v638_v21 = vadd.f32 %v2835_v20, %v2817_v28  ;;  %v837_v23 = vpop.f32.mrf.mxu0 }
 0x107   : > { %v595_v25 = vpop.f32.mrf.mxu1 }
 0x108   : > { %v3506_v27 = vadd.f32 %v2853_v19, %v638_v21  ;;  %v636_v49 = vadd.f32 %v595_v25, %v335_v30  ;;  %v2854_v29 = vpop.f32.mrf.mxu0 }
 0x109   : > { %v2836_v31 = vpop.f32.mrf.mxu1 }
 0x10a   : > { %v3508_v32 = vadd.f32 %v837_v23, %v636_v49  ;;  %v840_v24 = vpop.f32.mrf.mxu0 }
 0x10b   : > { %v598_v33 = vpop.f32.mrf.mxu1 }
 0x10c   : > { %3756 = vst [vmem:[#allocation6_spill] sm:$0xff] %v3508_v32  ;;  %v637_v35 = vadd.f32 %v598_v33, %v338_v34  ;;  %v2877_v36 = vpop.f32.mrf.mxu0 }
 0x10d   : > { %v2859_v37 = vpop.f32.mrf.mxu1 }
 0x10e   : > { %v3510_v26 = vadd.f32 %v840_v24, %v637_v35  ;;  %v1329_v38 = vpop.f32.mrf.mxu0 }
 0x10f   : > { %v1031_v39 = vpop.f32.mrf.mxu1 }
 0x110   : > { %3757 = vst [vmem:[#allocation7_spill] sm:$0xff] %v3510_v26  ;;  %v3512_v41 = vpop.f32.mrf.mxu0  ;;  %v1108_v32 = vadd.f32 %v1031_v39, %v3484_v44 }
 0x111   : > { %v2860_v28 = vpop.f32.mrf.mxu1 }
 0x112   : > { %v3514_v42 = vpop.f32.mrf.mxu0 }
 0x113   : > { %v1034_v43 = vpop.f32.mrf.mxu1 }
 0x114   : > { %v3516_v30 = vpop.f32.mrf.mxu0 }
 0x115   : > { %v2863_v45 = vpop.f32.mrf.mxu1 }
 0x116   : > { %v3518_v46 = vpop.f32.mrf.mxu0  ;;  %v1114_v39 = vadd.f32 %v2863_v45, %v3490_v58 }
 0x117   : > { %v3520_v47 = vpop.f32.mrf.mxu1 }
 0x118   : > { %v3522_v34 = vpop.f32.mrf.mxu0  ;;  %v1412_v58 = vadd.f32 %v3516_v30, %v1114_v39 }
 0x119   : > { %v3524_v50 = vpop.f32.mrf.mxu1 }
 0x11a   : > { %v3526_v51 = vpop.f32.mrf.mxu0 }
 0x11b   : > { %v3528_v52 = vpop.f32.mrf.mxu1 }
 0x11c   : > { %v3530_v55 = vpop.f32.mrf.mxu0 }
 0x11d   : > { %v3532_v56 = vpop.f32.mrf.mxu1 }
 0x11e   : > { %v3534_v57 = vpop.f32.mrf.mxu0 }
 0x11f   : > { %v3536_v59 = vpop.f32.mrf.mxu1 }
 0x120   : > { %v3538_v60 = vpop.f32.mrf.mxu0 }
 0x121   : > { %v3540_v61 = vpop.f32.mrf.mxu1 }
 0x122   : > { %v3542_v63 = vpop.f32.mrf.mxu0 }
 0x123   : > { %3758 = vst [vmem:[#allocation8_spill] sm:$0xff] %v3542_v63  ;;  %v3544_v0 = vpop.f32.mrf.mxu1 }
 0x124   : > { %v3546_v1 = vpop.f32.mrf.mxu0 }
 0x125   : > { %3759 = vst [vmem:[#allocation9_spill] sm:$0xff] %v3546_v1  ;;  %v3548_v3 = vpop.f32.mrf.mxu1 }
 0x126   : > { %v3550_v4 = vpop.f32.mrf.mxu0 }
 0x127   : > { %3760 = vst [vmem:[#allocation10_spill] sm:$0xff] %v3550_v4  ;;  %v3552_v5 = vpop.f32.mrf.mxu1  ;;  %v1110_v4 = vadd.f32 %v2859_v37, %v3482_v40  ;;  %v1109_v40 = vadd.f32 %v1034_v43, %v3488_v53  ;;  %v1115_v43 = vadd.f32 %v3524_v50, %v3494_v2 }
 0x128   : > { %3761 = vst [vmem:[#allocation11_spill] sm:$0xff] %v3552_v5  ;;  %v2890_v7 = vpop.f32.mrf.mxu0 }
 0x129   : > { %v2872_v8 = vpop.f32.mrf.mxu1 }
 0x12a   : > { %v3554_v9 = vpop.f32.mrf.mxu0 }
 0x12b   : > { %3762 = vst [vmem:[#allocation12_spill] sm:$0xff] %v3554_v9  ;;  %v3556_v11 = vpop.f32.mrf.mxu1 }
 0x12c   : > { %3763 = vst [vmem:[#allocation13_spill] sm:$0xff] %v3556_v11  ;;  %v2913_v12 = vpop.f32.mrf.mxu0 }
 0x12d   : > { %v2895_v13 = vpop.f32.mrf.mxu1 }
 0x12e   : > { %v1794_v54 = vpop.f32.mrf.mxu0 }
 0x12f   : > { %v1571_v15 = vpop.f32.mrf.mxu1 }
 0x130   : > { %v2914_v16 = vpop.f32.mrf.mxu0 }
 0x131   : > { %v2896_v18 = vpop.f32.mrf.mxu1 }
 0x132   : > { %v3558_v19 = vpop.f32.mrf.mxu0 }
 0x133   : > { %v1574_v20 = vpop.f32.mrf.mxu1 }
 0x134   : > { %v3560_v21 = vpop.f32.mrf.mxu0 }
 0x135   : > { %v2899_v23 = vpop.f32.mrf.mxu1 }
 0x136   : > { %v3562_v25 = vpop.f32.mrf.mxu0 }
 0x137   : > { %v1587_v49 = vpop.f32.mrf.mxu1 }
 0x138   : > { %v3564_v29 = vpop.f32.mrf.mxu0 }
 0x139   : > { %v3566_v31 = vpop.f32.mrf.mxu1 }
 0x13a   : > { %v3568_v24 = vpop.f32.mrf.mxu0 }
 0x13b   : > { %3764 = vst [vmem:[#allocation14_spill] sm:$0xff] %v3568_v24  ;;  %v3570_v33 = vpop.f32.mrf.mxu1  ;;  %v1111_v24 = vadd.f32 %v2860_v28, %v3486_v48  ;;  %v1112_v48 = vadd.f32 %v3520_v47, %v3492_v62  ;;  %v3621_v47 = vld [vmem:[%s3752_s2] ss:$0 sm:$0xff] }
 0x13c   : > { %v3572_v35 = vpop.f32.mrf.mxu0 }
 0x13d   : > { %3765 = vst [vmem:[#allocation15_spill] sm:$0xff] %v3572_v35  ;;  %v3574_v7 = vpop.f32.mrf.mxu1  ;;  %v1409_v44 = vadd.f32 %v3512_v41, %v1111_v24  ;;  %v1410_v62 = vadd.f32 %v3518_v46, %v1112_v48 }
 0x13e   : > { %v3576_v8 = vpop.f32.mrf.mxu0 }
 0x13f   : > { %3766 = vst [vmem:[#allocation16_spill] sm:$0xff] %v3576_v8  ;;  %v3578_v9 = vpop.f32.mrf.mxu1  ;;  %v1408_v8 = vadd.f32 %v2877_v36, %v1110_v4  ;;  %v1652_v46 = vadd.f32 %v1587_v49, %v1410_v62 }
 0x140   : > { %3767 = vst [vmem:[#allocation17_spill] sm:$0xff] %v3578_v9  ;;  %v3580_v11 = vpop.f32.mrf.mxu0 }
 0x141   : > { %3768 = vst [vmem:[#allocation18_spill] sm:$0xff] %v3580_v11  ;;  %v3582_v26 = vpop.f32.mrf.mxu1  ;;  %v1650_v37 = vadd.f32 %v2895_v13, %v1408_v8 }
 0x142   : > { %3769 = vst [vmem:[#allocation19_spill] sm:$0xff] %v3582_v26  ;;  %v3585_v1 = vpop.f32.mrf.mxu0  ;;  %v1406_v26 = vadd.f32 %v1329_v38, %v1108_v32  ;;  %v1407_v32 = vadd.f32 %v3514_v42, %v1109_v40  ;;  %v1651_v38 = vadd.f32 %v2896_v18, %v1409_v44  ;;  %v1113_v42 = vadd.f32 %v3528_v52, %v3496_v6 }
 0x143   : > { %3770 = vst [vmem:[#allocation20_spill] sm:$0xff] %v3585_v1  ;;  %v3587_v5 = vpop.f32.mrf.mxu1  ;;  %v1873_v53 = vadd.f32 %v2913_v12, %v1650_v37 }
 0x144   : > { %3771 = vst [vmem:[#allocation21_spill] sm:$0xff] %v3587_v5  ;;  %v3590_v35 = vpop.f32.mrf.mxu0  ;;  %v1649_v45 = vadd.f32 %v1574_v20, %v1407_v32  ;;  %v1874_v50 = vadd.f32 %v2914_v16, %v1651_v38  ;;  %v1411_v16 = vadd.f32 %v3526_v51, %v1113_v42  ;;  %v3777_v42 = vld [vmem:[#allocation6_spill] sm:$0xff] }
 0x145   : > { %3772 = vst [vmem:[#allocation22_spill] sm:$0xff] %v3590_v35  ;;  %v3592_v63 = vpop.f32.mrf.mxu1  ;;  %v1648_v35 = vadd.f32 %v1571_v15, %v1406_v26  ;;  %v1118_v15 = vadd.f32 %v3532_v56, %v3498_v10 }
 0x146   : > { %3773 = vst [vmem:[#allocation23_spill] sm:$0xff] %v3592_v63  ;;  %v3595_v9 = vpop.f32.mrf.mxu0  ;;  %v1872_v6 = vadd.f32 %v3558_v19, %v1649_v45 }
 0x147   : > { %v3597_v11 = vpop.f32.mrf.mxu1  ;;  %v1871_v26 = vadd.f32 %v1794_v54, %v1648_v35  ;;  %v1413_v54 = vadd.f32 %v3522_v34, %v1115_v43  ;;  %v1416_v51 = vadd.f32 %v3530_v55, %v1118_v15  ;;  %v1117_v55 = vadd.f32 %v3544_v0, %v3504_v22  ;;  %v3775_v0 = vld [vmem:[#allocation14_spill] sm:$0xff] }
 0x148   : > { %v2926_v1 = vpop.f32.mrf.mxu0 }
 0x149   : > { %v2908_v5 = vpop.f32.mrf.mxu1  ;;  %v1655_v8 = vadd.f32 %v3566_v31, %v1413_v54 }
 0x14a   : > { %v3602_v63 = vpop.f32.mrf.mxu0  ;;  %v1654_v5 = vadd.f32 %v2899_v23, %v1412_v58  ;;  %v1116_v23 = vadd.f32 %v3536_v59, %v3500_v14  ;;  %v1119_v14 = vadd.f32 %v3540_v61, %v3502_v17  ;;  %v1875_v59 = vadd.f32 %v3562_v25, %v1652_v46  ;;  %v3781_v46 = vld [vmem:[#allocation9_spill] sm:$0xff] }
 0x14b   : > { %v3607_v36 = vpop.f32.mrf.mxu1  ;;  %v1658_v61 = vadd.f32 %v3574_v7, %v1416_v51  ;;  %v3787_v51 = vld [vmem:[#allocation18_spill] sm:$0xff] }
 0x14c   : > { %v2949_v28 = vpop.f32.mrf.mxu0  ;;  %v1877_v40 = vadd.f32 %v3560_v21, %v1654_v5  ;;  %v1653_v21 = vadd.f32 %v3570_v33, %v1411_v16  ;;  %v1414_v32 = vadd.f32 %v3534_v57, %v1116_v23  ;;  %v1417_v43 = vadd.f32 %v3538_v60, %v1119_v14 }
 0x14d   : > { %v2931_v41 = vpop.f32.mrf.mxu1  ;;  %v1122_v57 = vadd.f32 %v3548_v3, %v3506_v27  ;;  %v3780_v3 = vld [vmem:[#allocation15_spill] sm:$0xff] }
 0x14e   : > { %v2162_v1 = vadd.f32 %v2931_v41, %v1873_v53  ;;  %v2324_v4 = vpop.f32.mrf.mxu0  ;;  %v1878_v53 = vadd.f32 %v3564_v29, %v1655_v8  ;;  %v3774_v41 = vld [vmem:[#allocation17_spill] sm:$0xff]  ;;  %v1876_v29 = vadd.f32 %v3775_v0, %v1653_v21 }
 0x14f   : > { %v2083_v2 = vpop.f32.mrf.mxu1  ;;  %v1656_v58 = vadd.f32 %v3774_v41, %v1414_v32  ;;  %v3791_v41 = vld [vmem:[#allocation22_spill] sm:$0xff] }
 0x150   : > { %v2403_v12 = vadd.f32 %v2949_v28, %v2162_v1  ;;  %v2160_v13 = vadd.f32 %v2083_v2, %v1871_v26  ;;  %v2950_v30 = vpop.f32.mrf.mxu0  ;;  %v3778_v2 = vld [vmem:[#allocation11_spill] sm:$0xff] }
 0x151   : > { %v2932_v18 = vpop.f32.mrf.mxu1  ;;  %v1120_v60 = vadd.f32 %v3778_v2, %v3777_v42 }
 0x152   : > { %v2455_v52 = vadd.f32 %v3621_v47, %v2403_v12  ;;  %v2401_v20 = vadd.f32 %v2324_v4, %v2160_v13  ;;  %v2163_v24 = vadd.f32 %v2932_v18, %v1874_v50  ;;  %v2327_v35 = vpop.f32.mrf.mxu0  ;;  %v3776_v4 = vld [vmem:[#allocation8_spill] sm:$0xff]  ;;  %v3779_v50 = vld [vmem:[#allocation19_spill] sm:$0xff]  ;;  %v1881_v12 = vadd.f32 %v3780_v3, %v1658_v61 }
 0x153   : > { %v2086_v34 = vpop.f32.mrf.mxu1  ;;  %v1415_v62 = vadd.f32 %v3776_v4, %v1117_v55  ;;  %v1659_v5 = vadd.f32 %v3779_v50, %v1417_v43  ;;  %v1420_v18 = vadd.f32 %v3781_v46, %v1122_v57 }
 0x154   : > { %2470 = vst [vmem:[%s3633_s6 + $0x10] sm:$0xff] %v2455_v52  ;;  %v2453_v10 = vadd.f32 %v3621_v47, %v2401_v20  ;;  %v2404_v56 = vadd.f32 %v2950_v30, %v2163_v24  ;;  %v2161_v19 = vadd.f32 %v2086_v34, %v1872_v6  ;;  %v2953_v49 = vpop.f32.mrf.mxu0  ;;  %v3782_v6 = vld [vmem:[#allocation16_spill] sm:$0xff]  ;;  %v3783_v24 = vld [vmem:[#allocation21_spill] sm:$0xff] }
 0x155   : > { %v2935_v31 = vpop.f32.mrf.mxu1  ;;  %v1879_v52 = vadd.f32 %v3782_v6, %v1656_v58  ;;  %v1882_v14 = vadd.f32 %v3787_v51, %v1659_v5 }
 0x156   : > { %2468 = vst [vmem:[%s3633_s6] sm:$0xff] %v2453_v10  ;;  %v2456_v37 = vadd.f32 %v3621_v47, %v2404_v56  ;;  %v2402_v44 = vadd.f32 %v2327_v35, %v2161_v19  ;;  %v2166_v39 = vadd.f32 %v2935_v31, %v1877_v40  ;;  %v2340_v48 = vpop.f32.mrf.mxu0  ;;  %v1657_v35 = vadd.f32 %v3783_v24, %v1415_v62  ;;  %v3784_v40 = vld [vmem:[#allocation10_spill] sm:$0xff]  ;;  %v3785_v56 = vld [vmem:[#allocation7_spill] sm:$0xff]  ;;  %v3786_v19 = vld [vmem:[#allocation13_spill] sm:$0xff] }
 0x157   : > { %v2099_v17 = vpop.f32.mrf.mxu1  ;;  %v1418_v10 = vadd.f32 %v3784_v40, %v1120_v60  ;;  %v3788_v31 = vld [vmem:[#allocation23_spill] sm:$0xff] }
 0x158   : > { %2471 = vst [vmem:[%s3633_s6 + $0x18] sm:$0xff] %v2456_v37  ;;  %v2454_v25 = vadd.f32 %v3621_v47, %v2402_v44  ;;  %v2407_v33 = vadd.f32 %v2953_v49, %v2166_v39  ;;  %v2164_v38 = vadd.f32 %v2099_v17, %v1875_v59  ;;  %v2954_v28 = vpop.f32.mrf.mxu0  ;;  %v1121_v49 = vadd.f32 %v3786_v19, %v3785_v56 }
 0x159   : > { %v2936_v22 = vpop.f32.mrf.mxu1  ;;  %v1662_v21 = vadd.f32 %v3788_v31, %v1420_v18  ;;  %v1660_v32 = vadd.f32 %v3597_v11, %v1418_v10 }
 0x15a   : > { %2469 = vst [vmem:[%s3633_s6 + $0x8] sm:$0xff] %v2454_v25  ;;  %v2459_v7 = vadd.f32 %v3621_v47, %v2407_v33  ;;  %v2405_v26 = vadd.f32 %v2340_v48, %v2164_v38  ;;  %v2167_v45 = vadd.f32 %v2936_v22, %v1878_v53  ;;  %v2343_v1 = vpop.f32.mrf.mxu0  ;;  %v3789_v53 = vld [vmem:[#allocation20_spill] sm:$0xff] }
 0x15b   : > { %v2102_v27 = vpop.f32.mrf.mxu1  ;;  %v1880_v17 = vadd.f32 %v3789_v53, %v1657_v35  ;;  %v1885_v58 = vadd.f32 %v3791_v41, %v1662_v21 }
 0x15c   : > { %2474 = vst [vmem:[%s3633_s6 + $0x30] sm:$0xff] %v2459_v7  ;;  %v2457_v13 = vadd.f32 %v3621_v47, %v2405_v26  ;;  %v2408_v30 = vadd.f32 %v2954_v28, %v2167_v45  ;;  %v2165_v54 = vadd.f32 %v2102_v27, %v1876_v29  ;;  %v2957_v15 = vpop.f32.mrf.mxu0  ;;  %v3790_v28 = vld [vmem:[#allocation12_spill] sm:$0xff]  ;;  %v1883_v7 = vadd.f32 %v3595_v9, %v1660_v32 }
 0x15d   : > { %v2939_v20 = vpop.f32.mrf.mxu1  ;;  %v1419_v43 = vadd.f32 %v3790_v28, %v1121_v49 }
 0x15e   : > { %2472 = vst [vmem:[%s3633_s6 + $0x20] sm:$0xff] %v2457_v13  ;;  %v2460_v16 = vadd.f32 %v3621_v47, %v2408_v30  ;;  %v2406_v23 = vadd.f32 %v2343_v1, %v2165_v54  ;;  %v2170_v8 = vadd.f32 %v2939_v20, %v1881_v12  ;;  %v2356_v34 = vpop.f32.mrf.mxu0 }
 0x15f   : > { %v2115_v59 = vpop.f32.mrf.mxu1  ;;  %v1661_v45 = vadd.f32 %v3607_v36, %v1419_v43 }
 0x160   : > { %2475 = vst [vmem:[%s3633_s6 + $0x38] sm:$0xff] %v2460_v16  ;;  %v2458_v37 = vadd.f32 %v3621_v47, %v2406_v23  ;;  %v2411_v44 = vadd.f32 %v2957_v15, %v2170_v8  ;;  %v2168_v39 = vadd.f32 %v2115_v59, %v1879_v52  ;;  %v2958_v48 = vpop.f32.mrf.mxu0 }
 0x161   : > { %v2940_v55 = vpop.f32.mrf.mxu1  ;;  %v1884_v36 = vadd.f32 %v3602_v63, %v1661_v45 }
 0x162   : > { %2473 = vst [vmem:[%s3633_s6 + $0x28] sm:$0xff] %v2458_v37  ;;  %v2463_v61 = vadd.f32 %v3621_v47, %v2411_v44  ;;  %v2409_v25 = vadd.f32 %v2356_v34, %v2168_v39  ;;  %v2171_v33 = vadd.f32 %v2940_v55, %v1882_v14  ;;  %v2359_v38 = vpop.f32.mrf.mxu0 }
 0x163   : > { %v2118_v57 = vpop.f32.mrf.mxu1 }
 0x164   : > { %2478 = vst [vmem:[%s3633_s6 + $0x50] sm:$0xff] %v2463_v61  ;;  %v2461_v22 = vadd.f32 %v3621_v47, %v2409_v25  ;;  %v2412_v11 = vadd.f32 %v2958_v48, %v2171_v33  ;;  %v2169_v0 = vadd.f32 %v2118_v57, %v1880_v17  ;;  %v2961_v29 = vpop.f32.mrf.mxu0 }
 0x165   : > { %v2943_v26 = vpop.f32.mrf.mxu1 }
 0x166   : > { %2476 = vst [vmem:[%s3633_s6 + $0x40] sm:$0xff] %v2461_v22  ;;  %v2464_v1 = vadd.f32 %v3621_v47, %v2412_v11  ;;  %v2410_v4 = vadd.f32 %v2359_v38, %v2169_v0  ;;  %v2174_v62 = vadd.f32 %v2943_v26, %v1885_v58  ;;  %v2372_v42 = vpop.f32.mrf.mxu0 }
 0x167   : > { %v2131_v2 = vpop.f32.mrf.mxu1 }
 0x168   : > { %2479 = vst [vmem:[%s3633_s6 + $0x58] sm:$0xff] %v2464_v1  ;;  %v2462_v60 = vadd.f32 %v3621_v47, %v2410_v4  ;;  %v2415_v50 = vadd.f32 %v2961_v29, %v2174_v62  ;;  %v2172_v9 = vadd.f32 %v2131_v2, %v1883_v7  ;;  %v2962_v5 = vpop.f32.mrf.mxu0 }
 0x169   : > { %v2944_v27 = vpop.f32.mrf.mxu1 }
 0x16a   : > { %2477 = vst [vmem:[%s3633_s6 + $0x48] sm:$0xff] %v2462_v60  ;;  %v2467_v3 = vadd.f32 %v3621_v47, %v2415_v50  ;;  %v2413_v12 = vadd.f32 %v2372_v42, %v2172_v9  ;;  %v2375_v15 = vpop.f32.mrf.mxu0 }
 0x16b   : > { %v2134_v13 = vpop.f32.mrf.mxu1 }
 0x16c   : > { %2482 = vst [vmem:[%s3633_s6 + $0x70] sm:$0xff] %v2467_v3  ;;  %v2465_v30 = vadd.f32 %v3621_v47, %v2413_v12  ;;  %v2173_v54 = vadd.f32 %v2134_v13, %v1884_v36 }
 0x16e   : > { %2480 = vst [vmem:[%s3633_s6 + $0x60] sm:$0xff] %v2465_v30  ;;  %v2414_v46 = vadd.f32 %v2375_v15, %v2173_v54 }
 0x170   : > { %v2466_v63 = vadd.f32 %v3621_v47, %v2414_v46 }
 0x172   : > { %2481 = vst [vmem:[%s3633_s6 + $0x68] sm:$0xff] %v2466_v63 }
 0x173   : > { %3104 = shalt.err (!%p3101_p3)
}
 0x174   : > { %s3105_s25 = scalar_lea.hbm %s3702_s11, 1920  ;;  %s3109_s28 = scalar_lea.hbm %s3753_s3, 3840 }
 0x175   : > { %p3106_p4 = scmp.ne.s32.totalorder %s3702_s11, %s3105_s25  ;;  %p3110_p9 = scmp.lt.s32.totalorder %s3702_s11, %s3753_s3 }
 0x176   : > { %p3111_p10 = scmp.lt.s32.totalorder %s3109_s28, %s3105_s25 }
 0x177   : > { %p3107_p7 = pnand %p3106_p4, %p3214_p5 }
 0x178   : > { %p3112_p11 = por %p3111_p10, %p3110_p9 }
 0x179   : > { %p3108_p8 = pneg %p3107_p7 }
 0x17b   : > { %p3113_p12 = pnand %p3112_p11, %p3108_p8 }
 0x17d   : > { %3116 = shalt.err (!%p3113_p12)
}
 0x17e   : > { %s3154_s4 = smov 128   ;;  %s3155_s5 = smov 8  }
 0x17f   : > { %2978 = dma.vmem_to_hbm [thread:$0]  (%p3214_p5), %s3704_s8, 1920, %s3702_s11, %s3710_s16, %s3154_s4, %s3154_s4, %s3155_s5  }
 0x180 PF: > { %p2984_p13 = scmp.ge.s32.totalorder %s3151_s15, 2  ;;  %s2512_s6 = sand.u32 1, %s3139_s12  }
 0x181   : > { %s2513_s7 = scalar_lea.sflag [#allocation4], %s2512_s6 }
 0x182   : > { %p2981_p0 = pnand %p2984_p13, %p3218_p6 }
 0x184   : > { %p2982_p1 = pneg %p2981_p0 }
 0x186   : > { %3134 = dma.done.wait (%p2982_p1), %s2513_s7, 1920  }
 0x187   : > { %3136 = vsyncadd (%p2982_p1), %s2513_s7, 4294965376  ;;  %p13_p2 = scmp.ge.s32.totalorder %s3201_s18, 4   ;;  %s3792_s12 = smov %s3143_s13 }
 0x188   : > { %s3793_s13 = smov %s3147_s14  ;;  %s3794_s14 = smov %s3212_s21 }
 0x189   : > { %s3795_s15 = smov %s3201_s18  ;;  %15 = sbr.rel (!%p13_p2) target bundleno = 3 (0x3), region = 75 }
 0x18e   :  { %2518 = vsyncpa [#allocation4], 1 }
 0x18f   :  { %2520 = vsyncpa [#allocation4 + $0x1], 1 }

</bundles_post_ra>
